<compile_context>
chip_gen: v5e
topology: v5e:2x2
jax: 0.10.0
libtpu: 0.0.40
codegen_flags: <defaults>
</compile_context>

<pallas_src>
import functools

import jax
import jax.numpy as jnp
from jax.experimental import pallas as pl
from jax.experimental.pallas import tpu as pltpu


def _round_up(x, m):
    return (x + m - 1) // m * m


# Row offset of the geo block inside the merged second-layer output (8-aligned
# so the (72, TN) slice starts on a sublane-tile boundary).
_GEO_ROW = 16


# ----------------------------------------------------------------------------
# Pallas kernel: per-pixel meta-kernel aggregation (lane-dense, batched matmuls)
# ----------------------------------------------------------------------------
def _meta_kernel(pn_ref, feat_ref, mask_ref,
                 wmap_ref, sh1_ref, w2g_ref, b2_ref, sh2_ref,
                 rep8_ref, repcf_ref, wag_ref, waf_ref, abnb_ref,
                 out_ref):
    pn = pn_ref[...]                       # (36, TN) f32 pre-centered coords
    valid = mask_ref[...] > 0.0            # (9, TN)

    # Fused first layers (attention + geo) for all 9 kernel positions, f32 MXU.
    h = jnp.dot(wmap_ref[...], pn, preferred_element_type=jnp.float32)
    h = jnp.maximum(h + sh1_ref[...], 0.0)                         # (144, TN)

    # Merged attention-logit + geo second layer: ONE bf16 MXU matmul.
    lg = jnp.dot(w2g_ref[...], h.astype(jnp.bfloat16),
                 preferred_element_type=jnp.float32)               # (88, TN)
    logits = jnp.where(valid, lg[0:9, :] + b2_ref[...], 0.0)       # (9, TN)
    g2 = jnp.maximum(lg[_GEO_ROW:_GEO_ROW + 72, :] + sh2_ref[...], 0.0)  # (72,TN)

    # Softmax over the 9 kernel positions (sublane axis), f32 throughout.
    m = jnp.max(logits, axis=0, keepdims=True)                     # (1, TN)
    e = jnp.exp(logits - m)                                        # (9, TN)
    denom = jnp.sum(e, axis=0, keepdims=True)                      # (1, TN)
    r = pl.reciprocal(denom, approx=True)
    r = r * (2.0 - denom * r)              # one Newton step (f32 accuracy)
    w = e * r                              # (9, TN) softmax weights
    wg = jnp.where(valid, w, 0.0)          # masked weights for the geo branch

    # Replicate the 9 weights across sublanes on the MXU (idle slot) instead
    # of XLU sublane broadcasts / per-k Python loops.
    w8 = jnp.dot(rep8_ref[...], wg, preferred_element_type=jnp.float32)   # (72, TN)
    wcf = jnp.dot(repcf_ref[...], w, preferred_element_type=jnp.float32)  # (9Cf, TN)

    geo_all = (w8 * g2).astype(jnp.bfloat16)                       # (72, TN)
    wfeat = (wcf * feat_ref[...]).astype(jnp.bfloat16)             # (9Cf, TN)

    # Final projection as two accumulating bf16 MXU dots (no concatenate copy;
    # the k-reduction of the weighted features rides on the MXU contraction).
    out = jnp.dot(wag_ref[...], geo_all, preferred_element_type=jnp.float32)
    out = out + jnp.dot(waf_ref[...], wfeat, preferred_element_type=jnp.float32)
    out = jnp.maximum(out + abnb_ref[...], 0.0)        # aggregation BN + ReLU
    out = jnp.where(valid[4:5, :], out, 0.0)           # scatter-into-zeros
    out_ref[...] = out.astype(out_ref.dtype)


# ----------------------------------------------------------------------------
# JAX glue
# ----------------------------------------------------------------------------
def unfold3x3_rows(x, dilation=1):
    """nn.Unfold(kernel_size=3, dilation=d, padding=d, stride=1) producing
    (B, 9*C, H*W), row index = k*C + c with k = ky*3 + kx (k=4 is the center)."""
    B, C, H, W = x.shape
    p = dilation
    xp = jnp.pad(x, ((0, 0), (0, 0), (p, p), (p, p)))
    cols = [xp[:, :, ky * dilation:ky * dilation + H,
               kx * dilation:kx * dilation + W]
            for ky in range(3) for kx in range(3)]
    u = jnp.stack(cols, axis=1)                 # (B, 9, C, H, W)
    return u.reshape(B, 9 * C, H * W)


def _choose_tile(hw, batch, cf, cout, tile_cap):
    """Cf/Cout-aware pixel-tile selection (bytes per lane of the double-buffered
    pipelined streams + f32 intermediates), kept inside a conservative VMEM
    budget so it fits v7x's 64 MiB physical VMEM with pipelining headroom."""
    stream = 2 * (36 * 4 + 9 * cf * 2 + 9 * 4 + cout * 4)          # 2 buffers
    interm = (144 + 88 + 72 + 72 + 72 + 2 * 9 * cf + 4 * 9 + 2 * cout) * 4
    per_lane = stream + interm
    vmem_budget = 24 << 20
    tile = min(tile_cap, _round_up(hw, 128))
    tile = min(tile, max(128, (vmem_budget // per_lane) // 128 * 128))
    # v7x megacore: guarantee >= 2 "parallel" grid steps so both TCs are used.
    while batch * ((hw + tile - 1) // tile) < 2 and tile > 128:
        tile = max(128, tile // 2)
    return tile, per_lane


@functools.partial(jax.jit, static_argnames=("dilation", "tile_cap"))
def meta_kernel_v6(x, mask, params, dilation=1, tile_cap=4096):
    B, C, H, W = x.shape
    cf = C - 4
    cout = params["abns"].shape[1]
    HW = H * W

    x = x.astype(jnp.float32)
    mask = mask.astype(jnp.float32)

    # Wrapper-side 3x3 unfold (im2col); channels-on-rows / pixels-on-lanes.
    pn = unfold3x3_rows(x[:, :4], dilation)                       # (B, 36, HW)
    pn = pn - jnp.tile(pn[:, 16:20, :], (1, 9, 1))                # center subtract (k=4)
    feat = unfold3x3_rows(x[:, 4:], dilation).astype(jnp.bfloat16)  # (B, 9Cf, HW) bf16
    mask9 = unfold3x3_rows(mask, dilation)                        # (B, 9, HW)

    # Pad the pixel (lane) axis to a multiple of the tile size.
    tile_n, per_lane = _choose_tile(HW, B, cf, cout, tile_cap)
    hw_pad = _round_up(HW, tile_n)
    if hw_pad != HW:
        padw = ((0, 0), (0, 0), (0, hw_pad - HW))
        pn = jnp.pad(pn, padw)
        feat = jnp.pad(feat, padw)
        mask9 = jnp.pad(mask9, padw)

    # ---- pack parameters (BN folded; per-kernel-position MLPs block-batched) ---
    eye9 = jnp.eye(9, dtype=jnp.float32)
    w1s = (params["w1"] * params["bn1s"]).T                        # (8, 4)  BN1 scale folded
    g1s = (params["g1"] * params["gbn1s"]).T                       # (8, 4)
    wmap = jnp.concatenate([jnp.kron(eye9, w1s),
                            jnp.kron(eye9, g1s)], axis=0)          # (144, 36)
    shift1 = jnp.concatenate([jnp.tile(params["bn1b"], (1, 9)),
                              jnp.tile(params["gbn1b"], (1, 9))],
                             axis=1).reshape(144, 1)
    # Merged (logits | geo second layer) block-diagonal weight, bf16.
    w2map = jnp.kron(eye9, params["w2"].T)                         # (9, 72)
    g2s = (params["g2"] * params["gbn2s"]).T                       # (8, 8)  BN2 scale folded
    g2map = jnp.kron(eye9, g2s)                                    # (72, 72)
    w2g = jnp.zeros((_GEO_ROW + 72, 144), jnp.float32)
    w2g = w2g.at[0:9, 0:72].set(w2map)
    w2g = w2g.at[_GEO_ROW:_GEO_ROW + 72, 72:144].set(g2map)
    w2g = w2g.astype(jnp.bfloat16)
    b2col = jnp.tile(params["b2"], (9, 1))                         # (9, 1)
    shift2 = jnp.tile(params["gbn2b"], (1, 9)).reshape(72, 1)
    # Sublane-replication matrices for the softmax weights (done on the MXU).
    rep8 = jnp.kron(eye9, jnp.ones((8, 1), jnp.float32))           # (72, 9)
    repcf = jnp.kron(eye9, jnp.ones((cf, 1), jnp.float32))         # (9Cf, 9)
    # Final projection weights (aggregation BN scale folded), bf16:
    #   geo part (Cout, 72) and feature part tiled over the 9 positions so the
    #   k-reduction happens inside the MXU contraction.
    wag_t = (params["wag"] * params["abns"]).T.astype(jnp.bfloat16)         # (Cout, 72)
    waf_t = (params["waf"] * params["abns"]).T                              # (Cout, Cf)
    waf_tiled = jnp.tile(waf_t, (1, 9)).astype(jnp.bfloat16)                # (Cout, 9Cf)
    abnb_col = params["abnb"].reshape(cout, 1)                              # (Cout, 1)

    grid = (B, hw_pad // tile_n)
    data_spec = lambda rows: pl.BlockSpec((None, rows, tile_n),
                                          lambda b, i: (b, 0, i))
    par_spec = lambda shape: pl.BlockSpec(shape, lambda b, i: (0, 0))

    vmem_limit = int(min(64 << 20, max(32 << 20, 2 * per_lane * tile_n)))

    out = pl.pallas_call(
        _meta_kernel,
        out_shape=jax.ShapeDtypeStruct((B, cout, hw_pad), jnp.float32),
        grid_spec=pltpu.PrefetchScalarGridSpec(
            num_scalar_prefetch=0,
            grid=grid,
            in_specs=[
                data_spec(36),                   # pn (pre-centered coords, f32)
                data_spec(9 * cf),               # feat (bf16)
                data_spec(9),                    # mask
                par_spec((144, 36)),             # fused first-layer weights
                par_spec((144, 1)),              # fused first-layer BN shifts
                par_spec((_GEO_ROW + 72, 144)),  # merged logit+geo2 weights (bf16)
                par_spec((9, 1)),                # weight_mlp2 bias
                par_spec((72, 1)),               # geo BN2 shift
                par_spec((72, 9)),               # softmax-weight repeat (x8)
                par_spec((9 * cf, 9)),           # softmax-weight repeat (xCf)
                par_spec((cout, 72)),            # aggregation weights, geo (bf16)
                par_spec((cout, 9 * cf)),        # aggregation weights, feat tiled (bf16)
                par_spec((cout, 1)),             # aggregation BN shift
            ],
            out_specs=data_spec(cout),
        ),
        compiler_params=pltpu.CompilerParams(
            dimension_semantics=("parallel", "parallel"),
            vmem_limit_bytes=vmem_limit),
    )(pn, feat, mask9, wmap, shift1, w2g, b2col, shift2,
      rep8, repcf, wag_t, waf_tiled, abnb_col)

    # (B, Cout, HW) is already NCHW order -> no transpose needed.
    return out[:, :, :HW].reshape(B, cout, H, W)


# ----------------------------------------------------------------------------
# Pure-JAX reference (mirrors the PyTorch forward, eval-mode BN, f32)
# ----------------------------------------------------------------------------
def _unfold3x3_nhwkc(x, dilation=1):
    B, C, H, W = x.shape
    p = dilation
    xp = jnp.pad(x, ((0, 0), (0, 0), (p, p), (p, p)))
    cols = [xp[:, :, ky * dilation:ky * dilation + H,
               kx * dilation:kx * dilation + W]
            for ky in range(3) for kx in range(3)]
    u = jnp.stack(cols, axis=2)               # (B, C, 9, H, W)
    u = u.transpose(0, 3, 4, 2, 1)            # (B, H, W, 9, C)
    return u.reshape(B, H * W, 9, C)


def meta_kernel_v6_reference(x, mask, params, dilation=1):
    B, C, H, W = x.shape
    cout = params["abns"].shape[1]
    xu = _unfold3x3_nhwkc(x.astype(jnp.float32), dilation)
    mu = _unfold3x3_nhwkc(mask.astype(jnp.float32), dilation)[..., 0]  # (B,HW,9)
    feat = xu[..., 4:]
    pn = xu[..., :4]
    pn_p0 = pn - pn[:, :, 4:5, :]
    valid = mu > 0

    h = jnp.maximum(pn_p0 @ params["w1"] * params["bn1s"] + params["bn1b"], 0.0)
    logits = h @ params["w2"] + params["b2"]
    logits = jnp.where(valid[..., None], logits, 0.0)
    w = jax.nn.softmax(logits[..., 0], axis=-1)[..., None]

    fsum = (w * feat).sum(axis=2)

    g = jnp.maximum(pn_p0 @ params["g1"] * params["gbn1s"] + params["gbn1b"], 0.0)
    g = jnp.maximum(g @ params["g2"] * params["gbn2s"] + params["gbn2b"], 0.0)
    g = jnp.where(valid[..., None], g, 0.0)
    g = (w * g).reshape(B, H * W, 72)

    cat = jnp.concatenate([fsum, g], axis=-1)
    wa = jnp.concatenate([params["waf"], params["wag"]], axis=0)
    out = jnp.maximum(cat @ wa * params["abns"] + params["abnb"], 0.0)
    out = jnp.where(mu[:, :, 4:5] > 0, out, 0.0)
    return out.transpose(0, 2, 1).reshape(B, cout, H, W)


# ----------------------------------------------------------------------------
# Deterministic parameter construction (BN folded to scale/shift, eval mode)
# ----------------------------------------------------------------------------
def make_params(key, cf, cout, eps=1e-5):
    ks = list(jax.random.split(key, 16))

    def bn(kg, kb, km, kv, n):
        gamma = 1.0 + 0.1 * jax.random.normal(kg, (1, n), jnp.float32)
        beta = 0.1 * jax.random.normal(kb, (1, n), jnp.float32)
        mean = 0.05 * jax.random.normal(km, (1, n), jnp.float32)
        var = 0.5 + jax.random.uniform(kv, (1, n), jnp.float32)
        scale = gamma / jnp.sqrt(var + eps)
        shift = beta - mean * scale
        return scale, shift

    bn1s, bn1b = bn(ks[4], ks[5], ks[6], ks[7], 8)
    gbn1s, gbn1b = bn(ks[8], ks[9], ks[10], ks[11], 8)
    gbn2s, gbn2b = bn(ks[12], ks[13], ks[14], ks[15], 8)
    abns, abnb = bn(ks[0], ks[1], ks[2], ks[3], cout)

    k_w = jax.random.split(jax.random.fold_in(key, 123), 6)
    return dict(
        w1=0.3 * jax.random.normal(k_w[0], (4, 8), jnp.float32),
        bn1s=bn1s, bn1b=bn1b,
        w2=0.3 * jax.random.normal(k_w[1], (8, 1), jnp.float32),
        b2=0.1 * jax.random.normal(jax.random.fold_in(key, 7), (1, 1), jnp.float32),
        g1=0.3 * jax.random.normal(k_w[2], (4, 8), jnp.float32),
        gbn1s=gbn1s, gbn1b=gbn1b,
        g2=0.3 * jax.random.normal(k_w[3], (8, 8), jnp.float32),
        gbn2s=gbn2s, gbn2b=gbn2b,
        waf=0.2 * jax.random.normal(k_w[4], (cf, cout), jnp.float32),
        wag=0.2 * jax.random.normal(k_w[5], (72, cout), jnp.float32),
        abns=abns, abnb=abnb,
    )


if __name__ == "__main__":
    # Small config: META_CHANNELS=4, INPUT_CHANNELS=4, OUTPUT_CHANNELS=16,
    # FEATURE_MAP_SIZE=(16,16), DILATION=1  ->  x: (2, 4+4, 16, 16)
    B, H, W = 2, 16, 16
    cf, cout, dilation = 4, 16, 1

    key = jax.random.PRNGKey(0)
    kx, km, kp = jax.random.split(key, 3)
    x = jax.random.normal(kx, (B, 4 + cf, H, W), jnp.float32)
    mask = (jax.random.uniform(km, (B, 1, H, W)) < 0.7).astype(jnp.float32)
    params = make_params(kp, cf, cout)

    out = jax.block_until_ready(meta_kernel_v6(x, mask, params, dilation=dilation))
    ref = jax.block_until_ready(
        meta_kernel_v6_reference(x, mask, params, dilation=dilation))

    assert out.shape == (B, cout, H, W), out.shape
    # Tolerance reflects bf16 MXU operands / bf16 feature stream (f32 reference).
    max_err = float(jnp.max(jnp.abs(out - ref)))
    assert jnp.allclose(out, ref, rtol=3e-2, atol=3e-2), max_err

    print("KERNEL_OK")
</pallas_src>

<mosaic_0001>
module attributes {stable_mosaic.version = 11 : i64} {
  func.func @_meta_kernel(%arg0: i32, %arg1: i32, %arg2: memref<1x36x256xf32, #tpu.memory_space<vmem>>, %arg3: memref<1x36x256xbf16, #tpu.memory_space<vmem>>, %arg4: memref<1x9x256xf32, #tpu.memory_space<vmem>>, %arg5: memref<144x36xf32, #tpu.memory_space<vmem>>, %arg6: memref<144x1xf32, #tpu.memory_space<vmem>>, %arg7: memref<88x144xbf16, #tpu.memory_space<vmem>>, %arg8: memref<9x1xf32, #tpu.memory_space<vmem>>, %arg9: memref<72x1xf32, #tpu.memory_space<vmem>>, %arg10: memref<72x9xf32, #tpu.memory_space<vmem>>, %arg11: memref<36x9xf32, #tpu.memory_space<vmem>>, %arg12: memref<16x72xbf16, #tpu.memory_space<vmem>>, %arg13: memref<16x36xbf16, #tpu.memory_space<vmem>>, %arg14: memref<16x1xf32, #tpu.memory_space<vmem>>, %arg15: memref<1x16x256xf32, #tpu.memory_space<vmem>>) attributes {dimension_semantics = [#tpu.dimension_semantics<parallel>, #tpu.dimension_semantics<parallel>], iteration_bounds = array<i64: 2, 1>, scalar_prefetch = 0 : i64, scratch_operands = 0 : i64, tpu.core_type = #tpu.core_type<tc>, window_params = [{transform_indices = @transform_0, window_bounds = array<i64: 1, 36, 256>}, {transform_indices = @transform_1, window_bounds = array<i64: 1, 36, 256>}, {transform_indices = @transform_2, window_bounds = array<i64: 1, 9, 256>}, {pipeline_mode = #tpu.pipeline_mode<synchronous>, transform_indices = @transform_3, window_bounds = array<i64: 144, 36>}, {pipeline_mode = #tpu.pipeline_mode<synchronous>, transform_indices = @transform_4, window_bounds = array<i64: 144, 1>}, {pipeline_mode = #tpu.pipeline_mode<synchronous>, transform_indices = @transform_5, window_bounds = array<i64: 88, 144>}, {pipeline_mode = #tpu.pipeline_mode<synchronous>, transform_indices = @transform_6, window_bounds = array<i64: 9, 1>}, {pipeline_mode = #tpu.pipeline_mode<synchronous>, transform_indices = @transform_7, window_bounds = array<i64: 72, 1>}, {pipeline_mode = #tpu.pipeline_mode<synchronous>, transform_indices = @transform_8, window_bounds = array<i64: 72, 9>}, {pipeline_mode = #tpu.pipeline_mode<synchronous>, transform_indices = @transform_9, window_bounds = array<i64: 36, 9>}, {pipeline_mode = #tpu.pipeline_mode<synchronous>, transform_indices = @transform_10, window_bounds = array<i64: 16, 72>}, {pipeline_mode = #tpu.pipeline_mode<synchronous>, transform_indices = @transform_11, window_bounds = array<i64: 16, 36>}, {pipeline_mode = #tpu.pipeline_mode<synchronous>, transform_indices = @transform_12, window_bounds = array<i64: 16, 1>}, {transform_indices = @transform_13, window_bounds = array<i64: 1, 16, 256>}]} {
    %c0 = arith.constant 0 : index
    %c0_0 = arith.constant 0 : index
    %c0_1 = arith.constant 0 : index
    %0 = vector.load %arg2[%c0, %c0_0, %c0_1] : memref<1x36x256xf32, #tpu.memory_space<vmem>>, vector<1x36x256xf32>
    %1 = vector.shape_cast %0 : vector<1x36x256xf32> to vector<36x256xf32>
    %c0_2 = arith.constant 0 : index
    %c0_3 = arith.constant 0 : index
    %c0_4 = arith.constant 0 : index
    %2 = vector.load %arg4[%c0_2, %c0_3, %c0_4] : memref<1x9x256xf32, #tpu.memory_space<vmem>>, vector<1x9x256xf32>
    %3 = vector.shape_cast %2 : vector<1x9x256xf32> to vector<9x256xf32>
    %cst = arith.constant 0.000000e+00 : f32
    %4 = vector.broadcast %cst : f32 to vector<9x256xf32>
    %5 = arith.cmpf ogt, %3, %4 : vector<9x256xf32>
    %c0_5 = arith.constant 0 : index
    %c0_6 = arith.constant 0 : index
    %6 = vector.load %arg5[%c0_5, %c0_6] : memref<144x36xf32, #tpu.memory_space<vmem>>, vector<144x36xf32>
    %cst_7 = arith.constant dense<0.000000e+00> : vector<144x256xf32>
    %7 = tpu.matmul %6, %1, %cst_7 {dimension_numbers = #tpu.dot_dimension_numbers<[1], [0], [0], [1], [0, 0, 1, 1], [], []>} : vector<144x36xf32>, vector<36x256xf32>, vector<144x256xf32> -> vector<144x256xf32>
    %c0_8 = arith.constant 0 : index
    %c0_9 = arith.constant 0 : index
    %8 = vector.load %arg6[%c0_8, %c0_9] : memref<144x1xf32, #tpu.memory_space<vmem>>, vector<144x1xf32>
    %9 = vector.broadcast %8 : vector<144x1xf32> to vector<144x256xf32>
    %10 = arith.addf %7, %9 : vector<144x256xf32>
    %cst_10 = arith.constant 0.000000e+00 : f32
    %11 = vector.broadcast %cst_10 : f32 to vector<144x256xf32>
    %12 = arith.maximumf %10, %11 : vector<144x256xf32>
    %c0_11 = arith.constant 0 : index
    %c0_12 = arith.constant 0 : index
    %13 = vector.load %arg7[%c0_11, %c0_12] : memref<88x144xbf16, #tpu.memory_space<vmem>>, vector<88x144xbf16>
    %14 = arith.truncf %12 : vector<144x256xf32> to vector<144x256xbf16>
    %cst_13 = arith.constant dense<0.000000e+00> : vector<88x256xf32>
    %15 = tpu.matmul %13, %14, %cst_13 {dimension_numbers = #tpu.dot_dimension_numbers<[1], [0], [0], [1], [0, 0, 1, 1], [], []>} : vector<88x144xbf16>, vector<144x256xbf16>, vector<88x256xf32> -> vector<88x256xf32>
    %16 = vector.extract_strided_slice %15 {offsets = [0, 0], sizes = [9, 256], strides = [1, 1]} : vector<88x256xf32> to vector<9x256xf32>
    %c0_14 = arith.constant 0 : index
    %c0_15 = arith.constant 0 : index
    %17 = vector.load %arg8[%c0_14, %c0_15] : memref<9x1xf32, #tpu.memory_space<vmem>>, vector<9x1xf32>
    %18 = vector.broadcast %17 : vector<9x1xf32> to vector<9x256xf32>
    %19 = arith.addf %16, %18 : vector<9x256xf32>
    %cst_16 = arith.constant 0.000000e+00 : f32
    %20 = vector.broadcast %cst_16 : f32 to vector<9x256xf32>
    %21 = arith.select %5, %19, %20 : vector<9x256xi1>, vector<9x256xf32>
    %22 = vector.extract_strided_slice %15 {offsets = [16, 0], sizes = [72, 256], strides = [1, 1]} : vector<88x256xf32> to vector<72x256xf32>
    %c0_17 = arith.constant 0 : index
    %c0_18 = arith.constant 0 : index
    %23 = vector.load %arg9[%c0_17, %c0_18] : memref<72x1xf32, #tpu.memory_space<vmem>>, vector<72x1xf32>
    %24 = vector.broadcast %23 : vector<72x1xf32> to vector<72x256xf32>
    %25 = arith.addf %22, %24 : vector<72x256xf32>
    %cst_19 = arith.constant 0.000000e+00 : f32
    %26 = vector.broadcast %cst_19 : f32 to vector<72x256xf32>
    %27 = arith.maximumf %25, %26 : vector<72x256xf32>
    %cst_20 = arith.constant dense<0xFF800000> : vector<256xf32>
    %28 = vector.multi_reduction <maximumf>, %21, %cst_20 [0] : vector<9x256xf32> to vector<256xf32>
    %29 = vector.shape_cast %28 : vector<256xf32> to vector<1x256xf32>
    %30 = vector.broadcast %29 : vector<1x256xf32> to vector<9x256xf32>
    %31 = arith.subf %21, %30 : vector<9x256xf32>
    %32 = math.exp %31 : vector<9x256xf32>
    %cst_21 = arith.constant dense<0.000000e+00> : vector<256xf32>
    %33 = vector.multi_reduction <add>, %32, %cst_21 [0] : vector<9x256xf32> to vector<256xf32>
    %34 = vector.shape_cast %33 : vector<256xf32> to vector<1x256xf32>
    %35 = tpu.reciprocal %34 {approx = true} : vector<1x256xf32> -> vector<1x256xf32>
    %36 = arith.mulf %34, %35 : vector<1x256xf32>
    %cst_22 = arith.constant 2.000000e+00 : f32
    %37 = vector.broadcast %cst_22 : f32 to vector<1x256xf32>
    %38 = arith.subf %37, %36 : vector<1x256xf32>
    %39 = arith.mulf %35, %38 : vector<1x256xf32>
    %40 = vector.broadcast %39 : vector<1x256xf32> to vector<9x256xf32>
    %41 = arith.mulf %32, %40 : vector<9x256xf32>
    %cst_23 = arith.constant 0.000000e+00 : f32
    %42 = vector.broadcast %cst_23 : f32 to vector<9x256xf32>
    %43 = arith.select %5, %41, %42 : vector<9x256xi1>, vector<9x256xf32>
    %c0_24 = arith.constant 0 : index
    %c0_25 = arith.constant 0 : index
    %44 = vector.load %arg10[%c0_24, %c0_25] : memref<72x9xf32, #tpu.memory_space<vmem>>, vector<72x9xf32>
    %cst_26 = arith.constant dense<0.000000e+00> : vector<72x256xf32>
    %45 = tpu.matmul %44, %43, %cst_26 {dimension_numbers = #tpu.dot_dimension_numbers<[1], [0], [0], [1], [0, 0, 1, 1], [], []>} : vector<72x9xf32>, vector<9x256xf32>, vector<72x256xf32> -> vector<72x256xf32>
    %c0_27 = arith.constant 0 : index
    %c0_28 = arith.constant 0 : index
    %46 = vector.load %arg11[%c0_27, %c0_28] : memref<36x9xf32, #tpu.memory_space<vmem>>, vector<36x9xf32>
    %cst_29 = arith.constant dense<0.000000e+00> : vector<36x256xf32>
    %47 = tpu.matmul %46, %41, %cst_29 {dimension_numbers = #tpu.dot_dimension_numbers<[1], [0], [0], [1], [0, 0, 1, 1], [], []>} : vector<36x9xf32>, vector<9x256xf32>, vector<36x256xf32> -> vector<36x256xf32>
    %48 = arith.mulf %45, %27 : vector<72x256xf32>
    %49 = arith.truncf %48 : vector<72x256xf32> to vector<72x256xbf16>
    %c0_30 = arith.constant 0 : index
    %c0_31 = arith.constant 0 : index
    %c0_32 = arith.constant 0 : index
    %50 = vector.load %arg3[%c0_30, %c0_31, %c0_32] : memref<1x36x256xbf16, #tpu.memory_space<vmem>>, vector<1x36x256xbf16>
    %51 = vector.shape_cast %50 : vector<1x36x256xbf16> to vector<36x256xbf16>
    %52 = arith.extf %51 : vector<36x256xbf16> to vector<36x256xf32>
    %53 = arith.mulf %47, %52 : vector<36x256xf32>
    %54 = arith.truncf %53 : vector<36x256xf32> to vector<36x256xbf16>
    %c0_33 = arith.constant 0 : index
    %c0_34 = arith.constant 0 : index
    %55 = vector.load %arg12[%c0_33, %c0_34] : memref<16x72xbf16, #tpu.memory_space<vmem>>, vector<16x72xbf16>
    %cst_35 = arith.constant dense<0.000000e+00> : vector<16x256xf32>
    %56 = tpu.matmul %55, %49, %cst_35 {dimension_numbers = #tpu.dot_dimension_numbers<[1], [0], [0], [1], [0, 0, 1, 1], [], []>} : vector<16x72xbf16>, vector<72x256xbf16>, vector<16x256xf32> -> vector<16x256xf32>
    %c0_36 = arith.constant 0 : index
    %c0_37 = arith.constant 0 : index
    %57 = vector.load %arg13[%c0_36, %c0_37] : memref<16x36xbf16, #tpu.memory_space<vmem>>, vector<16x36xbf16>
    %cst_38 = arith.constant dense<0.000000e+00> : vector<16x256xf32>
    %58 = tpu.matmul %57, %54, %cst_38 {dimension_numbers = #tpu.dot_dimension_numbers<[1], [0], [0], [1], [0, 0, 1, 1], [], []>} : vector<16x36xbf16>, vector<36x256xbf16>, vector<16x256xf32> -> vector<16x256xf32>
    %59 = arith.addf %56, %58 : vector<16x256xf32>
    %c0_39 = arith.constant 0 : index
    %c0_40 = arith.constant 0 : index
    %60 = vector.load %arg14[%c0_39, %c0_40] : memref<16x1xf32, #tpu.memory_space<vmem>>, vector<16x1xf32>
    %61 = vector.broadcast %60 : vector<16x1xf32> to vector<16x256xf32>
    %62 = arith.addf %59, %61 : vector<16x256xf32>
    %cst_41 = arith.constant 0.000000e+00 : f32
    %63 = vector.broadcast %cst_41 : f32 to vector<16x256xf32>
    %64 = arith.maximumf %62, %63 : vector<16x256xf32>
    %65 = vector.extract_strided_slice %5 {offsets = [4, 0], sizes = [1, 256], strides = [1, 1]} : vector<9x256xi1> to vector<1x256xi1>
    %cst_42 = arith.constant 0.000000e+00 : f32
    %66 = vector.shape_cast %65 : vector<1x256xi1> to vector<1x256xi1>
    %67 = vector.broadcast %66 : vector<1x256xi1> to vector<16x256xi1>
    %68 = vector.broadcast %cst_42 : f32 to vector<16x256xf32>
    %69 = arith.select %67, %64, %68 : vector<16x256xi1>, vector<16x256xf32>
    %c0_43 = arith.constant 0 : index
    %c0_44 = arith.constant 0 : index
    %c0_45 = arith.constant 0 : index
    %70 = vector.load %arg15[%c0_43, %c0_44, %c0_45] : memref<1x16x256xf32, #tpu.memory_space<vmem>>, vector<1x16x256xf32>
    %71 = vector.shape_cast %70 : vector<1x16x256xf32> to vector<16x256xf32>
    %72 = vector.shape_cast %69 : vector<16x256xf32> to vector<1x16x256xf32>
    tpu.vector_store %arg15[%c0_43, %c0_44, %c0_45], %72 {strides = array<i32>} : memref<1x16x256xf32, #tpu.memory_space<vmem>>, vector<1x16x256xf32>,
    return
  }
  func.func @transform_0(%arg0: i32, %arg1: i32) -> (i32, i32, i32) {
    %c0_i32 = arith.constant 0 : i32
    %c0_i32_0 = arith.constant 0 : i32
    return %arg0, %c0_i32, %arg1 : i32, i32, i32
  }
  func.func @transform_1(%arg0: i32, %arg1: i32) -> (i32, i32, i32) {
    %c0_i32 = arith.constant 0 : i32
    %c0_i32_0 = arith.constant 0 : i32
    return %arg0, %c0_i32, %arg1 : i32, i32, i32
  }
  func.func @transform_2(%arg0: i32, %arg1: i32) -> (i32, i32, i32) {
    %c0_i32 = arith.constant 0 : i32
    %c0_i32_0 = arith.constant 0 : i32
    return %arg0, %c0_i32, %arg1 : i32, i32, i32
  }
  func.func @transform_3(%arg0: i32, %arg1: i32) -> (i32, i32) {
    %c0_i32 = arith.constant 0 : i32
    %c0_i32_0 = arith.constant 0 : i32
    %c0_i32_1 = arith.constant 0 : i32
    return %c0_i32, %c0_i32_0 : i32, i32
  }
  func.func @transform_4(%arg0: i32, %arg1: i32) -> (i32, i32) {
    %c0_i32 = arith.constant 0 : i32
    %c0_i32_0 = arith.constant 0 : i32
    %c0_i32_1 = arith.constant 0 : i32
    return %c0_i32, %c0_i32_0 : i32, i32
  }
  func.func @transform_5(%arg0: i32, %arg1: i32) -> (i32, i32) {
    %c0_i32 = arith.constant 0 : i32
    %c0_i32_0 = arith.constant 0 : i32
    %c0_i32_1 = arith.constant 0 : i32
    return %c0_i32, %c0_i32_0 : i32, i32
  }
  func.func @transform_6(%arg0: i32, %arg1: i32) -> (i32, i32) {
    %c0_i32 = arith.constant 0 : i32
    %c0_i32_0 = arith.constant 0 : i32
    %c0_i32_1 = arith.constant 0 : i32
    return %c0_i32, %c0_i32_0 : i32, i32
  }
  func.func @transform_7(%arg0: i32, %arg1: i32) -> (i32, i32) {
    %c0_i32 = arith.constant 0 : i32
    %c0_i32_0 = arith.constant 0 : i32
    %c0_i32_1 = arith.constant 0 : i32
    return %c0_i32, %c0_i32_0 : i32, i32
  }
  func.func @transform_8(%arg0: i32, %arg1: i32) -> (i32, i32) {
    %c0_i32 = arith.constant 0 : i32
    %c0_i32_0 = arith.constant 0 : i32
    %c0_i32_1 = arith.constant 0 : i32
    return %c0_i32, %c0_i32_0 : i32, i32
  }
  func.func @transform_9(%arg0: i32, %arg1: i32) -> (i32, i32) {
    %c0_i32 = arith.constant 0 : i32
    %c0_i32_0 = arith.constant 0 : i32
    %c0_i32_1 = arith.constant 0 : i32
    return %c0_i32, %c0_i32_0 : i32, i32
  }
  func.func @transform_10(%arg0: i32, %arg1: i32) -> (i32, i32) {
    %c0_i32 = arith.constant 0 : i32
    %c0_i32_0 = arith.constant 0 : i32
    %c0_i32_1 = arith.constant 0 : i32
    return %c0_i32, %c0_i32_0 : i32, i32
  }
  func.func @transform_11(%arg0: i32, %arg1: i32) -> (i32, i32) {
    %c0_i32 = arith.constant 0 : i32
    %c0_i32_0 = arith.constant 0 : i32
    %c0_i32_1 = arith.constant 0 : i32
    return %c0_i32, %c0_i32_0 : i32, i32
  }
  func.func @transform_12(%arg0: i32, %arg1: i32) -> (i32, i32) {
    %c0_i32 = arith.constant 0 : i32
    %c0_i32_0 = arith.constant 0 : i32
    %c0_i32_1 = arith.constant 0 : i32
    return %c0_i32, %c0_i32_0 : i32, i32
  }
  func.func @transform_13(%arg0: i32, %arg1: i32) -> (i32, i32, i32) {
    %c0_i32 = arith.constant 0 : i32
    %c0_i32_0 = arith.constant 0 : i32
    return %arg0, %c0_i32, %arg1 : i32, i32, i32
  }
}

</mosaic_0001>

<bundles_post_ra>
// kernel: meta_kernel_v6.1
= control target key start
LH: loop header
LB: loop body
LE: loop exit
PB: predicated region body
PF: predicated region fallthrough
CT: control target
= control target key end

     0   :  { %s2375_s25 = smov 0   ;;  %s2377_s26 = smov 0   ;;  %s3226_s0 = inlined_call_operand.vmem [shape: f32[2,36,256], index: 0, kind: input, shape index: {}]   ;;  %s3227_s1 = inlined_call_operand.vmem [shape: bf16[2,36,256], index: 1, kind: input, shape index: {}]   ;;  %s3228_s2 = inlined_call_operand.vmem [shape: f32[2,9,256], index: 2, kind: input, shape index: {}]   ;;  %s3229_s3 = inlined_call_operand.vmem [shape: f32[144,36], index: 3, kind: input, shape index: {}]   ;;  %s3230_s4 = inlined_call_operand.vmem [shape: f32[144,1], index: 4, kind: input, shape index: {}]   ;;  %s3231_s5 = inlined_call_operand.vmem [shape: bf16[88,144], index: 5, kind: input, shape index: {}]   ;;  %s3232_s6 = inlined_call_operand.vmem [shape: f32[9,1], index: 6, kind: input, shape index: {}]   ;;  %s3233_s7 = inlined_call_operand.vmem [shape: f32[72,1], index: 7, kind: input, shape index: {}]   ;;  %s3234_s8 = inlined_call_operand.vmem [shape: f32[72,9], index: 8, kind: input, shape index: {}]   ;;  %s3235_s9 = inlined_call_operand.vmem [shape: f32[36,9], index: 9, kind: input, shape index: {}]   ;;  %s3236_s10 = inlined_call_operand.vmem [shape: bf16[16,72], index: 10, kind: input, shape index: {}]   ;;  %s3237_s11 = inlined_call_operand.vmem [shape: bf16[16,36], index: 11, kind: input, shape index: {}]   ;;  %s3238_s12 = inlined_call_operand.vmem [shape: f32[16,1], index: 12, kind: input, shape index: {}]   ;;  %s3239_s13 = inlined_call_operand.vmem [shape: f32[2,16,256], index: 13, kind: output, shape index: {}]  }
   0x1   :  { %s2379_s27 = smov 0  }
   0x2 LB: > { %s35_s28 = sadd.s32 1, %s2298_s26  ;;  %p2079_p0 = scmp.ge.s32.totalorder %s2302_s27, 1  ;;  %s2302_s27 = sphi %s2379_s27, %s23_s27   ;;  %s2298_s26 = sphi %s2377_s26, %s3241_s26   ;;  %s2294_s25 = sphi %s2375_s25, %s3240_s25  }
   0x3   : > { %p37_p1 = scmp.ge.s32.totalorder %s35_s28, 2  ;;  %p442_p2 = scmp.lt.s32.totalorder %s2302_s27, 3 }
   0x5   : > { %s3243_s28 = smov (%p37_p1, %s35_s28), 0  ;;  %p443_p3 = pnand %p2079_p0, %p442_p2 }
   0x6   : > { %p513_p4 = scmp.lt.s32.totalorder (!%p443_p3), %s2294_s25, 1 }
   0x7   : > { %446 = sbr.rel (%p443_p3) target bundleno = 981 (0x3d5), region = 72 }
   0xc   : > { %v603_v0 = vld [vmem:[%s3230_s4 + $0x70] sm:$0xff]  ;;  %v2304_v1 = vmov 0   ;;  %v601_v2 = vld [vmem:[%s3230_s4 + $0x60] sm:$0xff]  ;;  %s3245_s25 = smov (!%p513_p4, %s2294_s25), 1  ;;  %vm752_vm0 = vcmask 1043456   ;;  %v604_v4 = vld [vmem:[%s3230_s4 + $0x78] sm:$0xff] }
   0xd   : > { %2265 = vset.pattern.permute.xlu0 %v2304_v1  ;;  %2267 = vset.pattern.permute.xlu2 %v2304_v1  ;;  %v599_v3 = vld [vmem:[%s3230_s4 + $0x50] sm:$0xff]  ;;  %s2238_s18 = smul.u32 80, %s3245_s25  ;;  %v602_v9 = vld [vmem:[%s3230_s4 + $0x68] sm:$0xff]  ;;  %v600_v11 = vld [vmem:[%s3230_s4 + $0x58] sm:$0xff]  ;;  %vm697_vm1 = vcmask 293888   ;;  %vm1017_vm2 = vcmask 130048  }
   0xe   : > { %679 = vperm.xlu0 %2265, %v603_v0   ;;  %2266 = vset.pattern.permute.xlu1 %v2304_v1  ;;  %v571_v17 = vld [vmem:[%s3229_s3] sm:$0xff]  ;;  %v598_v19 = vld [vmem:[%s3230_s4 + $0x48] sm:$0xff]  ;;  %v595_v20 = vld [vmem:[%s3230_s4 + $0x30] sm:$0xff]  ;;  %s2224_s30 = sshll.u32 %s3245_s25, 5  ;;  %vm1298_vm5 = vcmask 1040384   ;;  %vm1368_vm6 = vcmask 72704  }
   0xf   : > { %669 = vperm.xlu1 %2266, %v601_v2   ;;  %659 = vperm.xlu2 %2267, %v599_v3   ;;  %s520_s21 = scalar_lea.vmem %s3226_s0, %s2238_s18  ;;  %v597_v18 = vld [vmem:[%s3230_s4 + $0x40] sm:$0xff]  ;;  %v572_v21 = vld [vmem:[%s3229_s3 + $0x8] sm:$0xff]  ;;  %v596_v22 = vld [vmem:[%s3230_s4 + $0x38] sm:$0xff]  ;;  %s2766_s16 = scalar_lea.vmem %s3228_s2, %s2224_s30  ;;  %vm1651_vm9 = vcmask 1041408   ;;  %vm1691_vm10 = vcmask 588800   ;;  %vm1883_vm11 = vcmask 1041409  }
  0x10   : > { %v561_v5 = vld [vmem:[%s520_s21 + $0x40] sm:$0xf]  ;;  %v562_v6 = vld [vmem:[%s520_s21 + $0x48] sm:$0xf]  ;;  %v559_v7 = vld [vmem:[%s520_s21 + $0x30] sm:$0xff]  ;;  %vm1886_vm12 = vcmask 1042434   ;;  %s3137_s20 = scalar_lea.vmem %s3239_s13, %s2224_s30 }
  0x11   : > { %2086 = vmatpush.msk.msra.mxu0 %vm752_vm0, %v561_v5  ;;  %2105 = vmatpush.msk.msra.mxu1 %vm752_vm0, %v562_v6  ;;  %v560_v8 = vld [vmem:[%s520_s21 + $0x38] sm:$0xff]  ;;  %v557_v10 = vld [vmem:[%s520_s21 + $0x20] sm:$0xff]  ;;  %v558_v12 = vld [vmem:[%s520_s21 + $0x28] sm:$0xff]  ;;  %vm1889_vm13 = vcmask 1043459   ;;  %vm1891_vm14 = vcmask 1044484   ;;  %vm1894_vm15 = vcmask 1045509  }
  0x12   : > { %v555_v13 = vld [vmem:[%s520_s21 + $0x10] sm:$0xff]  ;;  %v556_v14 = vld [vmem:[%s520_s21 + $0x18] sm:$0xff]  ;;  %v553_v15 = vld [vmem:[%s520_s21] sm:$0xff] }
  0x13   : > { %771 = vmatpush.msra.mxu0 %v559_v7  ;;  %842 = vmatpush.msra.mxu1 %v560_v8  ;;  %v554_v16 = vld [vmem:[%s520_s21 + $0x8] sm:$0xff]  ;;  %v593_v23 = vld [vmem:[%s3230_s4 + $0x20] sm:$0xff]  ;;  %v573_v25 = vld [vmem:[%s3229_s3 + $0x10] sm:$0xff]  ;;  %s2239_s21 = smul.u32 40, %s3245_s25 }
  0x14   : > { %v594_v24 = vld [vmem:[%s3230_s4 + $0x28] sm:$0xff]  ;;  %v591_v26 = vld [vmem:[%s3230_s4 + $0x10] sm:$0xff]  ;;  %v592_v27 = vld [vmem:[%s3230_s4 + $0x18] sm:$0xff] }
  0x15   : > { %772 = vmatpush.msra.mxu0 %v557_v10  ;;  %843 = vmatpush.msra.mxu1 %v558_v12  ;;  %v589_v28 = vld [vmem:[%s3230_s4] sm:$0xff]  ;;  %v574_v29 = vld [vmem:[%s3229_s3 + $0x18] sm:$0xff]  ;;  %v590_v30 = vld [vmem:[%s3230_s4 + $0x8] sm:$0xff]  ;;  %s530_s24 = scalar_lea.vmem %s3227_s1, %s2239_s21 }
  0x16   : > { %684 = vperm.xlu0 %2265, %v604_v4   ;;  %v575_v31 = vld [vmem:[%s3229_s3 + $0x20] sm:$0xff]  ;;  %v576_v32 = vld [vmem:[%s3229_s3 + $0x28] sm:$0xff]  ;;  %v577_v33 = vld [vmem:[%s3229_s3 + $0x30] sm:$0xff] }
  0x17   : > { %674 = vperm.xlu1 %2266, %v602_v9   ;;  %664 = vperm.xlu2 %2267, %v600_v11   ;;  %v605_v34 = vld [vmem:[%s3230_s4 + $0x80] sm:$0xff]  ;;  %v1189_v35 = vld [vmem:[%s3232_s6 + $0x8] sm:$0x1]  ;;  %v578_v36 = vld [vmem:[%s3229_s3 + $0x38] sm:$0xff] }
  0x18   : > { %773 = vmatpush.msra.mxu0 %v555_v13  ;;  %844 = vmatpush.msra.mxu1 %v556_v14  ;;  %v1188_v37 = vld [vmem:[%s3232_s6] sm:$0xff]  ;;  %v1214_v38 = vld [vmem:[%s3233_s7 + $0x30] sm:$0xff]  ;;  %v1215_v40 = vld [vmem:[%s3233_s7 + $0x38] sm:$0xff] }
  0x19   : > { %v579_v39 = vld [vmem:[%s3229_s3 + $0x40] sm:$0xff]  ;;  %v1213_v41 = vld [vmem:[%s3233_s7 + $0x28] sm:$0xff]  ;;  %v1210_v43 = vld [vmem:[%s3233_s7 + $0x10] sm:$0xff] }
  0x1a   : > { %774 = vmatpush.msra.mxu0 %v553_v15  ;;  %845 = vmatpush.msra.mxu1 %v554_v16  ;;  %v580_v42 = vld [vmem:[%s3229_s3 + $0x48] sm:$0xff]  ;;  %v1208_v44 = vld [vmem:[%s3233_s7] sm:$0xff]  ;;  %v581_v46 = vld [vmem:[%s3229_s3 + $0x50] sm:$0xff] }
  0x1b   : > { %2087 = vmatmul.msk.f32.vlgmr.msra.gmra.mxu0 %vm697_vm1, %v571_v17  ;;  %2106 = vmatmul.msk.f32.vlgmr.msra.gmra.mxu1 %vm697_vm1, %v571_v17  ;;  %v606_v45 = vld [vmem:[%s3230_s4 + $0x88] sm:$0xff]  ;;  %v1216_v49 = vld [vmem:[%s3233_s7 + $0x40] sm:$0xff]  ;;  %v582_v50 = vld [vmem:[%s3229_s3 + $0x58] sm:$0xff] }
  0x1c   : > { %v1209_v47 = vld [vmem:[%s3233_s7 + $0x8] sm:$0xff]  ;;  %v583_v51 = vld [vmem:[%s3229_s3 + $0x60] sm:$0xff]  ;;  %v1211_v54 = vld [vmem:[%s3233_s7 + $0x18] sm:$0xff] }
  0x1d   : > { %v1730_v48 = vld [vmem:[%s3238_s12 + $0x8] sm:$0xff]  ;;  %v1212_v52 = vld [vmem:[%s3233_s7 + $0x20] sm:$0xff]  ;;  %v585_v55 = vld [vmem:[%s3229_s3 + $0x70] sm:$0xff] }
  0x1e   : > { %649 = vperm.xlu0 %2265, %v597_v18   ;;  %v584_v53 = vld [vmem:[%s3229_s3 + $0x68] sm:$0xff]  ;;  %v1729_v56 = vld [vmem:[%s3238_s12] sm:$0xff]  ;;  %v586_v57 = vld [vmem:[%s3229_s3 + $0x78] sm:$0xff] }
  0x1f   : > { %654 = vperm.xlu1 %2266, %v598_v19   ;;  %639 = vperm.xlu2 %2267, %v595_v20   ;;  %v587_v59 = vld [vmem:[%s3229_s3 + $0x80] sm:$0xff]  ;;  %v588_v62 = vld [vmem:[%s3229_s3 + $0x88] sm:$0xff] }
  0x23   : > { %2088 = vmatmul.msk.f32.gmra.mxu0 %vm697_vm1, %v572_v21  ;;  %2107 = vmatmul.msk.f32.gmra.mxu1 %vm697_vm1, %v572_v21 }
  0x26   : > { %644 = vperm.xlu0 %2265, %v596_v22  }
  0x27   : > { %629 = vperm.xlu1 %2266, %v593_v23   ;;  %634 = vperm.xlu2 %2267, %v594_v24  }
  0x2b   : > { %2089 = vmatmul.msk.f32.gmra.mxu0 %vm697_vm1, %v573_v25  ;;  %2108 = vmatmul.msk.f32.gmra.mxu1 %vm697_vm1, %v573_v25 }
  0x2e   : > { %619 = vperm.xlu0 %2265, %v591_v26  }
  0x2f   : > { %624 = vperm.xlu1 %2266, %v592_v27   ;;  %609 = vperm.xlu2 %2267, %v589_v28  }
  0x33   : > { %2090 = vmatmul.msk.f32.gmra.mxu0 %vm697_vm1, %v574_v29  ;;  %2109 = vmatmul.msk.f32.gmra.mxu1 %vm697_vm1, %v574_v29 }
  0x36   : > { %614 = vperm.xlu0 %2265, %v590_v30  }
  0x37   : > { %689 = vperm.xlu1 %2266, %v605_v34   ;;  %694 = vperm.xlu2 %2267, %v606_v45  }
  0x3b   : > { %2091 = vmatmul.msk.f32.gmra.mxu0 %vm697_vm1, %v575_v31  ;;  %2110 = vmatmul.msk.f32.gmra.mxu1 %vm697_vm1, %v575_v31 }
  0x3e   : > { %1197 = vperm.xlu0 %2265, %v1189_v35  }
  0x3f   : > { %1192 = vperm.xlu1 %2266, %v1188_v37   ;;  %1259 = vperm.xlu2 %2267, %v1216_v49  }
  0x43   : > { %2092 = vmatmul.msk.f32.gmra.mxu0 %vm697_vm1, %v576_v32  ;;  %2111 = vmatmul.msk.f32.gmra.mxu1 %vm697_vm1, %v576_v32 }
  0x46   : > { %1249 = vperm.xlu0 %2265, %v1214_v38  }
  0x47   : > { %1254 = vperm.xlu1 %2266, %v1215_v40   ;;  %1239 = vperm.xlu2 %2267, %v1212_v52  }
  0x4b   : > { %2093 = vmatmul.msk.f32.gmra.mxu0 %vm697_vm1, %v577_v33  ;;  %2112 = vmatmul.msk.f32.gmra.mxu1 %vm697_vm1, %v577_v33 }
  0x4e   : > { %1244 = vperm.xlu0 %2265, %v1213_v41  }
  0x4f   : > { %1229 = vperm.xlu1 %2266, %v1210_v43   ;;  %1234 = vperm.xlu2 %2267, %v1211_v54  }
  0x53   : > { %2094 = vmatmul.msk.f32.gmra.mxu0 %vm697_vm1, %v578_v36  ;;  %2113 = vmatmul.msk.f32.gmra.mxu1 %vm697_vm1, %v578_v36 }
  0x56   : > { %1219 = vperm.xlu0 %2265, %v1208_v44  }
  0x57   : > { %1224 = vperm.xlu1 %2266, %v1209_v47   ;;  %1733 = vperm.xlu2 %2267, %v1729_v56  }
  0x5b   : > { %2095 = vmatmul.msk.f32.gmra.mxu0 %vm697_vm1, %v579_v39  ;;  %2114 = vmatmul.msk.f32.gmra.mxu1 %vm697_vm1, %v579_v39 }
  0x5e   : > { %1738 = vperm.xlu0 %2265, %v1730_v48  }
  0x63   : > { %2096 = vmatmul.msk.f32.gmra.mxu0 %vm697_vm1, %v580_v42  ;;  %2115 = vmatmul.msk.f32.gmra.mxu1 %vm697_vm1, %v580_v42 }
  0x69   : > { %v2612_v11 = vpop.permute.xlu2 %659 }
  0x6b   : > { %2097 = vmatmul.msk.f32.gmra.mxu0 %vm697_vm1, %v581_v46  ;;  %2116 = vmatmul.msk.f32.gmra.mxu1 %vm697_vm1, %v581_v46 }
  0x71   : > { %v2618_v16 = vpop.permute.xlu2 %664 }
  0x73   : > { %2098 = vmatmul.msk.f32.gmra.mxu0 %vm697_vm1, %v582_v50  ;;  %2117 = vmatmul.msk.f32.gmra.mxu1 %vm697_vm1, %v582_v50 }
  0x79   : > { %v640_v21 = vpop.permute.xlu2 %639 }
  0x7b   : > { %2099 = vmatmul.msk.f32.gmra.mxu0 %vm697_vm1, %v583_v51  ;;  %2118 = vmatmul.msk.f32.gmra.mxu1 %vm697_vm1, %v583_v51 }
  0x80   : > { %v2608_v8 = vpop.permute.xlu0 %679 }
  0x81   : > { %v2614_v12 = vpop.permute.xlu1 %669  ;;  %v2632_v47 = vpop.permute.xlu2 %634 }
  0x83   : > { %2100 = vmatmul.msk.f32.gmra.mxu0 %vm697_vm1, %v584_v53  ;;  %2119 = vmatmul.msk.f32.gmra.mxu1 %vm697_vm1, %v584_v53 }
  0x88   : > { %v2616_v13 = vpop.permute.xlu0 %684 }
  0x89   : > { %v2620_v17 = vpop.permute.xlu1 %674 }
  0x8b   : > { %2101 = vmatmul.msk.f32.gmra.mxu0 %vm697_vm1, %v585_v55  ;;  %2120 = vmatmul.msk.f32.gmra.mxu1 %vm697_vm1, %v585_v55 }
  0x90   : > { %v650_v18 = vpop.permute.xlu0 %649 }
  0x91   : > { %v655_v22 = vpop.permute.xlu1 %654 }
  0x93   : > { %2102 = vmatmul.msk.f32.gmra.mxu0 %vm697_vm1, %v586_v57  ;;  %2121 = vmatmul.msk.f32.gmra.mxu1 %vm697_vm1, %v586_v57 }
  0x98   : > { %v2574_v58 = vpop.f32.mrf.mxu0  ;;  %v2579_v60 = vpop.f32.mrf.mxu1 }
  0x99   : > { %v645_v24 = vpop.permute.xlu0 %644  ;;  %v2630_v46 = vpop.permute.xlu1 %629 }
  0x9b   : > { %2103 = vmatmul.msk.f32.gmra.mxu0 %vm697_vm1, %v587_v59  ;;  %2122 = vmatmul.msk.f32.gmra.mxu1 %vm697_vm1, %v587_v59 }
  0xa0   : > { %v2583_v61 = vpop.f32.mrf.mxu0  ;;  %v2588_v63 = vpop.f32.mrf.mxu1 }
  0xa3   : > { %2104 = vmatmul.msk.f32.gmra.mxu0 %vm697_vm1, %v588_v62  ;;  %2123 = vmatmul.msk.f32.gmra.mxu1 %vm697_vm1, %v588_v62  ;;  %v2639_v62 = vpop.permute.xlu1 %624 }
  0xa8   : > { %v2592_v0 = vpop.f32.mrf.mxu0  ;;  %v2594_v1 = vpop.f32.mrf.mxu1 }
  0xb0   : > { %v2596_v2 = vpop.f32.mrf.mxu0  ;;  %v2598_v3 = vpop.f32.mrf.mxu1 }
  0xb8   : > { %v2600_v4 = vpop.f32.mrf.mxu0  ;;  %v2602_v5 = vpop.f32.mrf.mxu1 }
  0xc0   : > { %v2604_v6 = vpop.f32.mrf.mxu0  ;;  %v2606_v7 = vpop.f32.mrf.mxu1 }
  0xc8   : > { %v2610_v9 = vpop.f32.mrf.mxu0  ;;  %v865_v10 = vpop.f32.mrf.mxu1 }
  0xc9   : > { %v866_v26 = vadd.f32 %v865_v10, %v640_v21 }
  0xcb   : > { %v914_v30 = vmax.f32 %v866_v26, 0.0 }
  0xd0   : > { %v797_v14 = vpop.f32.mrf.mxu0  ;;  %v868_v15 = vpop.f32.mrf.mxu1 }
  0xd1   : > { %v869_v27 = vadd.f32 %v868_v15, %v645_v24 }
  0xd3   : > { %v916_v31 = vmax.f32 %v869_v27, 0.0 }
  0xd5   : > { %v2626_v37 = vpack.c.bf16 %v916_v31, %v914_v30  ;;  %v2644_v31 = vpop.permute.xlu0 %619 }
  0xd8   : > { %v800_v19 = vpop.f32.mrf.mxu0  ;;  %v871_v20 = vpop.f32.mrf.mxu1 }
  0xd9   : > { %v872_v28 = vadd.f32 %v871_v20, %v650_v18  ;;  %v2642_v20 = vpop.permute.xlu2 %609 }
  0xdb   : > { %v918_v32 = vmax.f32 %v872_v28, 0.0 }
  0xe0   : > { %v803_v23 = vpop.f32.mrf.mxu0  ;;  %v874_v25 = vpop.f32.mrf.mxu1 }
  0xe1   : > { %v875_v29 = vadd.f32 %v874_v25, %v655_v22  ;;  %v804_v26 = vadd.f32 %v803_v23, %v655_v22  ;;  %v792_v22 = vadd.f32 %v2604_v6, %v2632_v47  ;;  %v2226_v6 = vld [vmem:[%s3231_s5 + $0x4] sm:$0xf] }
  0xe3   : > { %v920_v33 = vmax.f32 %v875_v29, 0.0  ;;  %v801_v29 = vadd.f32 %v800_v19, %v650_v18  ;;  %v695_v18 = vpop.permute.xlu2 %694 }
  0xe5   : > { %v2624_v36 = vpack.c.bf16 %v920_v33, %v918_v32  ;;  %v798_v32 = vadd.f32 %v797_v14, %v645_v24  ;;  %v919_v33 = vmax.f32 %v804_v26, 0.0 }
  0xe8   : > { %v806_v34 = vpop.f32.mrf.mxu0  ;;  %v2622_v35 = vpop.f32.mrf.mxu1 }
  0xe9   : > { %v807_v10 = vadd.f32 %v806_v34, %v2612_v11  ;;  %v690_v34 = vpop.permute.xlu1 %689 }
  0xeb   : > { %v921_v30 = vmax.f32 %v807_v10, 0.0 }
  0xf0   : > { %v809_v38 = vpop.f32.mrf.mxu0  ;;  %v2628_v39 = vpop.f32.mrf.mxu1 }
  0xf1   : > { %v810_v56 = vadd.f32 %v809_v38, %v2618_v16 }
  0xf3   : > { %v923_v27 = vmax.f32 %v810_v56, 0.0  ;;  %v615_v56 = vpop.permute.xlu0 %614 }
  0xf8   : > { %v812_v40 = vpop.f32.mrf.mxu0  ;;  %v883_v41 = vpop.f32.mrf.mxu1 }
  0xf9   : > { %v813_v52 = vadd.f32 %v812_v40, %v2614_v12  ;;  %v958_v40 = vpack.c.bf16 %v923_v27, %v921_v30 }
  0xfb   : > { %v925_v15 = vmax.f32 %v813_v52, 0.0  ;;  %v884_v52 = vadd.f32 %v883_v41, %v2614_v12  ;;  %v786_v12 = vadd.f32 %v2596_v2, %v2639_v62  ;;  %v911_v41 = vmax.f32 %v792_v22, 0.0 }
 0x100   : > { %v815_v42 = vpop.f32.mrf.mxu0  ;;  %v886_v43 = vpop.f32.mrf.mxu1 }
 0x101   : > { %v816_v50 = vadd.f32 %v815_v42, %v2620_v17  ;;  %v795_v42 = vadd.f32 %v2610_v9, %v640_v21  ;;  %v887_v9 = vadd.f32 %v886_v43, %v2620_v17  ;;  %v878_v43 = vadd.f32 %v2622_v35, %v2612_v11 }
 0x102   : > { %v780_v11 = vadd.f32 %v2583_v61, %v615_v56 }
 0x103   : > { %v927_v57 = vmax.f32 %v816_v50, 0.0  ;;  %v915_v50 = vmax.f32 %v798_v32, 0.0 }
 0x105   : > { %v960_v28 = vpack.c.bf16 %v927_v57, %v925_v15  ;;  %v926_v57 = vmax.f32 %v884_v52, 0.0 }
 0x108   : > { %v818_v44 = vpop.f32.mrf.mxu0  ;;  %v889_v45 = vpop.f32.mrf.mxu1 }
 0x109   : > { %v819_v48 = vadd.f32 %v818_v44, %v2608_v8  ;;  %v890_v19 = vadd.f32 %v889_v45, %v2608_v8  ;;  %v2128_v8 = vld [vmem:[%s3231_s5 + $0x8] sm:$0xf0] }
 0x10a   : > { %v2667_v15 = vor.u32 %v2226_v6, %v2128_v8  ;;  %v2232_v8 = vld [vmem:[%s3231_s5 + $0x34] sm:$0xf] }
 0x10b   : > { %v929_v53 = vmax.f32 %v819_v48, 0.0  ;;  %v917_v48 = vmax.f32 %v801_v29, 0.0  ;;  %v930_v17 = vmax.f32 %v890_v19, 0.0 }
 0x10d   : > { %v956_v24 = vpack.c.bf16 %v919_v33, %v917_v48  ;;  %v903_v33 = vmax.f32 %v780_v11, 0.0  ;;  %v2126_v48 = vld [vmem:[%s3231_s5] sm:$0xf] }
 0x110   : > { %v821_v49 = vpop.f32.mrf.mxu0  ;;  %v892_v55 = vpop.f32.mrf.mxu1 }
 0x111   : > { %v822_v51 = vadd.f32 %v821_v49, %v2616_v13  ;;  %v893_v44 = vadd.f32 %v892_v55, %v2616_v13  ;;  %v789_v13 = vadd.f32 %v2600_v4, %v2630_v46  ;;  %v881_v4 = vadd.f32 %v2628_v39, %v2618_v16 }
 0x112   : > { %v907_v16 = vmax.f32 %v786_v12, 0.0  ;;  %v922_v39 = vmax.f32 %v878_v43, 0.0  ;;  %v2152_v12 = vld [vmem:[%s3231_s5 + $0x38] sm:$0xf0]  ;;  %v2233_v43 = vld [vmem:[%s3231_s5 + $0x34] sm:$0xf0] }
 0x113   : > { %v931_v54 = vmax.f32 %v822_v51, 0.0  ;;  %v913_v51 = vmax.f32 %v795_v42, 0.0  ;;  %v932_v21 = vmax.f32 %v893_v44, 0.0  ;;  %v909_v2 = vmax.f32 %v789_v13, 0.0 }
 0x114   : > { %v924_v27 = vmax.f32 %v881_v4, 0.0 }
 0x115   : > { %v962_v59 = vpack.c.bf16 %v931_v54, %v929_v53  ;;  %v954_v45 = vpack.c.bf16 %v915_v50, %v913_v51  ;;  %v963_v10 = vpack.c.bf16 %v932_v21, %v930_v17  ;;  %v952_v35 = vpack.c.bf16 %v911_v41, %v909_v2  ;;  %v2136_v50 = vld [vmem:[%s3231_s5 + $0x18] sm:$0xf0]  ;;  %v2144_v21 = vld [vmem:[%s3231_s5 + $0x28] sm:$0xf0]  ;;  %v2150_v17 = vld [vmem:[%s3231_s5 + $0x30] sm:$0xf] }
 0x116   : > { %v959_v61 = vpack.c.bf16 %v924_v27, %v922_v39  ;;  %v851_v51 = vadd.f32 %v2588_v63, %v615_v56  ;;  %v2155_v41 = vor.u32 %v2232_v8, %v2152_v12  ;;  %v2151_v4 = vor.u32 %v2233_v43, %v2150_v17 }
 0x117   : > { %1036 = vmatpush.bf16.msra.mxu2 %v962_v59  ;;  %v928_v59 = vmax.f32 %v887_v9, 0.0 }
 0x118   : > { %v824_v25 = vpop.f32.mrf.mxu0  ;;  %v895_v38 = vpop.f32.mrf.mxu1 }
 0x119   : > { %v825_v49 = vadd.f32 %v824_v25, %v690_v34  ;;  %v783_v25 = vadd.f32 %v2592_v0, %v2644_v31  ;;  %v961_v29 = vpack.c.bf16 %v928_v59, %v926_v57  ;;  %v777_v0 = vadd.f32 %v2574_v58, %v2642_v20  ;;  %v2158_v57 = vld [vmem:[%s3231_s5 + $0x40] sm:$0xf]  ;;  %v2235_v59 = vld [vmem:[%s3231_s5 + $0x44] sm:$0xf0] }
 0x11a   : > { %v896_v32 = vadd.f32 %v895_v38, %v690_v34  ;;  %v860_v38 = vadd.f32 %v2602_v5, %v2630_v46  ;;  %v863_v34 = vadd.f32 %v2606_v7, %v2632_v47  ;;  %v854_v5 = vadd.f32 %v2594_v1, %v2644_v31 }
 0x11b   : > { %1037 = vmatpush.bf16.msra.mxu2 %v960_v28  ;;  %v933_v53 = vmax.f32 %v825_v49, 0.0  ;;  %v905_v30 = vmax.f32 %v783_v25, 0.0  ;;  %v901_v44 = vmax.f32 %v777_v0, 0.0  ;;  %v2227_v49 = vld [vmem:[%s3231_s5 + $0x4] sm:$0xf0]  ;;  %v857_v7 = vadd.f32 %v2598_v3, %v2639_v62  ;;  %v2772_v0 = vld [vmem:[%s2766_s16] sm:$0xff] }
 0x11c   : > { %v934_v22 = vmax.f32 %v896_v32, 0.0  ;;  %v2127_v19 = vor.u32 %v2227_v49, %v2126_v48  ;;  %v910_v46 = vmax.f32 %v860_v38, 0.0  ;;  %v912_v47 = vmax.f32 %v863_v34, 0.0  ;;  %v2134_v62 = vld [vmem:[%s3231_s5 + $0x10] sm:$0xf]  ;;  %v2774_v32 = vpop.permute.xlu1 %1192 }
 0x11d   : > { %v948_v58 = vpack.c.bf16 %v903_v33, %v901_v44  ;;  %v906_v52 = vmax.f32 %v854_v5, 0.0  ;;  %v904_v31 = vmax.f32 %v851_v51, 0.0  ;;  %v2159_v25 = vor.u32 %v2235_v59, %v2158_v57 }
 0x11e   : > { %v953_v9 = vpack.c.bf16 %v912_v47, %v910_v46  ;;  %vm567_vm4 = vcmp.gt.f32.partialorder %v2772_v0, 0.0 }
 0x11f   : > { %1038 = vmatpush.bf16.msra.mxu2 %v958_v40  ;;  %v950_v40 = vpack.c.bf16 %v907_v16, %v905_v30 }
 0x120   : > { %v827_v23 = vpop.f32.mrf.mxu0  ;;  %v898_v26 = vpop.f32.mrf.mxu1 }
 0x121   : > { %v828_v14 = vadd.f32 %v827_v23, %v695_v18  ;;  %v899_v28 = vadd.f32 %v898_v26, %v695_v18  ;;  %v2228_v23 = vld [vmem:[%s3231_s5 + $0x14] sm:$0xf] }
 0x123   : > { %v935_v54 = vmax.f32 %v828_v14, 0.0  ;;  %1039 = vmatpush.bf16.msra.mxu2 %v956_v24  ;;  %v936_v42 = vmax.f32 %v899_v28, 0.0  ;;  %v2139_v14 = vor.u32 %v2228_v23, %v2136_v50  ;;  %v848_v24 = vadd.f32 %v2579_v60, %v2642_v20  ;;  %v2230_v20 = vld [vmem:[%s3231_s5 + $0x24] sm:$0xf] }
 0x124   : > { %v2147_v13 = vor.u32 %v2230_v20, %v2144_v21 }
 0x125   : > { %v964_v55 = vpack.c.bf16 %v935_v54, %v933_v53  ;;  %v965_v18 = vpack.c.bf16 %v936_v42, %v934_v22  ;;  %v902_v1 = vmax.f32 %v848_v24, 0.0  ;;  %v2142_v53 = vld [vmem:[%s3231_s5 + $0x20] sm:$0xf]  ;;  %v2231_v54 = vld [vmem:[%s3231_s5 + $0x24] sm:$0xf0] }
 0x126   : > { %v2143_v6 = vor.u32 %v2231_v54, %v2142_v53 }
 0x127   : > { %1040 = vmatpush.bf16.msra.mxu2 %v954_v45  ;;  %1081 = vmatpush.bf16.msra.mxu3 %v964_v55  ;;  %v949_v60 = vpack.c.bf16 %v904_v31, %v902_v1  ;;  %v2234_v45 = vld [vmem:[%s3231_s5 + $0x44] sm:$0xf]  ;;  %v2160_v55 = vld [vmem:[%s3231_s5 + $0x48] sm:$0xf0] }
 0x128   : > { %v2163_v56 = vor.u32 %v2234_v45, %v2160_v55 }
 0x12a   : > { %2164 = vmatmul.msk.bf16.vlgmr.msra.gmra.mxu3 %vm1017_vm2, %v2667_v15 }
 0x12b   : > { %1112 = vmatpush.bf16.msrb.mxu3 %v963_v10  ;;  %1041 = vmatpush.bf16.msra.mxu2 %v952_v35  ;;  %v947_v10 = vld [vmem:[%s3231_s5 + $0x50] sm:$0xff] }
 0x12c   : > { %v998_v2 = vunpack.c.h.b16 %v947_v10  ;;  %v997_v11 = vunpack.c.l.b16 %v947_v10 }
 0x12e   : > { %v2750_v26 = vpack.c.b16 %v998_v2, %v998_v2  ;;  %v1009_v16 = vpack.c.b16 %v997_v11, %v997_v11 }
 0x12f   : > { %1113 = vmatpush.bf16.msrb.mxu3 %v961_v29  ;;  %1042 = vmatpush.bf16.msra.mxu2 %v950_v40  ;;  %v2769_v29 = vld [vmem:[%s2766_s16 + $0x10] sm:$0x1]  ;;  %v2776_v40 = vpop.permute.xlu0 %1197 }
 0x130   : > { %vm569_vm3 = vcmp.gt.f32.partialorder %v2769_v29, 0.0 }
 0x133   : > { %1114 = vmatpush.bf16.msrb.mxu3 %v959_v61  ;;  %1043 = vmatpush.bf16.msra.mxu2 %v948_v58 }
 0x136   : > { %1044 = vmatmul.bf16.vlgmr.msra.gmra.mxu2 %v2127_v19 }
 0x137   : > { %1115 = vmatpush.bf16.msrb.mxu3 %v2624_v36  ;;  %1157 = vmatpush.bf16.msrb.mxu2 %v965_v18  ;;  %v908_v36 = vmax.f32 %v857_v7, 0.0 }
 0x139   : > { %v951_v3 = vpack.c.bf16 %v908_v36, %v906_v52 }
 0x13a   : > { %2165 = vmatmul.msk.bf16.gmra.mxu3 %vm1017_vm2, %v2139_v14 }
 0x13b   : > { %1116 = vmatpush.bf16.msrb.mxu3 %v2626_v37  ;;  %v2229_v37 = vld [vmem:[%s3231_s5 + $0x14] sm:$0xf0] }
 0x13c   : > { %v2135_v63 = vor.u32 %v2229_v37, %v2134_v62 }
 0x13f   : > { %1117 = vmatpush.bf16.msrb.mxu3 %v953_v9 }
 0x143   : > { %1118 = vmatpush.bf16.msrb.mxu3 %v951_v3 }
 0x146   : > { %1049 = vmatmul.bf16.gmra.mxu2 %v2135_v63 }
 0x147   : > { %1119 = vmatpush.bf16.msrb.mxu3 %v949_v60 }
 0x14a   : > { %2166 = vmatmul.msk.bf16.gmra.mxu3 %vm1017_vm2, %v2147_v13 }
 0x156   : > { %1054 = vmatmul.bf16.gmra.mxu2 %v2143_v6 }
 0x15a   : > { %2167 = vmatmul.msk.bf16.gmra.mxu3 %vm1017_vm2, %v2155_v41 }
 0x166   : > { %1059 = vmatmul.bf16.gmra.mxu2 %v2151_v4 }
 0x16a   : > { %2168 = vmatmul.msk.bf16.gmra.mxu3 %vm1017_vm2, %v2163_v56 }
 0x176   : > { %1064 = vmatmul.bf16.gmra.mxu2 %v2159_v25 }
 0x17a   : > { %2169 = vmatmul.msk.bf16.gmra.mxu3 %vm1017_vm2, %v2750_v26 }
 0x186   : > { %1069 = vmatmul.bf16.gmra.mxu2 %v1009_v16 }
 0x18a   : > { %1120 = vmatmul.bf16.vlgmr.msrb.gmra.mxu3 %v2127_v19 }
 0x196   : > { %2170 = vmatmul.msk.bf16.vlgmr.msrb.gmra.mxu2 %vm1017_vm2, %v2667_v15 }
 0x19a   : > { %1125 = vmatmul.bf16.gmra.mxu3 %v2135_v63 }
 0x1a6   : > { %2171 = vmatmul.msk.bf16.gmra.mxu2 %vm1017_vm2, %v2139_v14 }
 0x1aa   : > { %1130 = vmatmul.bf16.gmra.mxu3 %v2143_v6 }
 0x1ad   : > { %v1083_v35 = vpop.f32.mrf.mxu3 }
 0x1b5   : > { %v1085_v39 = vpop.f32.mrf.mxu3 }
 0x1b6   : > { %2172 = vmatmul.msk.bf16.gmra.mxu2 %vm1017_vm2, %v2147_v13 }
 0x1b9   : > { %v1045_v27 = vpop.f32.mrf.mxu2 }
 0x1ba   : > { %1135 = vmatmul.bf16.gmra.mxu3 %v2151_v4  ;;  %v1084_v15 = vadd.f32 %v1083_v35, %v1045_v27 }
 0x1bc   : > { %v1200_v42 = vadd.f32 %v2774_v32, %v1084_v15  ;;  %v2830_v15 = vld [vmem:[%s3234_s8 + $0x8] sm:$0xff] }
 0x1bd   : > { %v2759_v28 = vpop.f32.mrf.mxu3 }
 0x1be   : > { %v1204_v49 = vsel %vm567_vm4, %v1200_v42, 0.0 }
 0x1c1   : > { %v1047_v30 = vpop.f32.mrf.mxu2 }
 0x1c2   : > { %v1086_v33 = vadd.f32 %v1085_v39, %v1047_v30  ;;  %v2837_v30 = vld [vmem:[%s3235_s9] sm:$0xff] }
 0x1c4   : > { %v1202_v61 = vadd.f32 %v2776_v40, %v1086_v33 }
 0x1c5   : > { %v2782_v44 = vpop.f32.mrf.mxu3 }
 0x1c6   : > { %v1206_v48 = vsel %vm569_vm3, %v1202_v61, 0.0  ;;  %2173 = vmatmul.msk.bf16.gmra.mxu2 %vm1017_vm2, %v2155_v41  ;;  %v2846_v61 = vld [vmem:[%s3234_s8 + $0x10] sm:$0xff] }
 0x1c7   : > { %v1299_v22 = vsel %vm1298_vm5, %v1206_v48, -inf }
 0x1c8   : > { %v1300_v58 = vmax.f32 %v1204_v49, %v1299_v22 }
 0x1c9   : > { %v2790_v38 = vpop.f32.mrf.mxu2 }
 0x1ca   : > { %v1301_v34 = vrot.slane %v1300_v58, 4  ;;  %1140 = vmatmul.bf16.gmra.mxu3 %v2159_v25 }
 0x1cc   : > { %v1302_v18 = vmax.f32 %v1300_v58, %v1301_v34  ;;  %v2860_v58 = vld [vmem:[%s3234_s8 + $0x18] sm:$0xff]  ;;  %v2865_v34 = vld [vmem:[%s3235_s9 + $0x10] sm:$0xff] }
 0x1cd   : > { %v2792_v19 = vpop.f32.mrf.mxu3 }
 0x1ce   : > { %v1303_v23 = vrot.slane %v1302_v18, 2 }
 0x1d0   : > { %v1304_v50 = vmax.f32 %v1302_v18, %v1303_v23 }
 0x1d1   : > { %v2794_v5 = vpop.f32.mrf.mxu2 }
 0x1d2   : > { %v1305_v7 = vrot.slane %v1304_v50, 1 }
 0x1d4   : > { %v1306_v46 = vmax.f32 %v1304_v50, %v1305_v7  ;;  %v2872_v50 = vld [vmem:[%s2766_s16 + $0x18] sm:$0x1]  ;;  %v2875_v7 = vld [vmem:[%s2766_s16 + $0x8] sm:$0xff] }
 0x1d5   : > { %v1095_v47 = vpop.f32.mrf.mxu3  ;;  %vm570_vm7 = vcmp.gt.f32.partialorder %v2872_v50, 0.0  ;;  %vm568_vm8 = vcmp.gt.f32.partialorder %v2875_v7, 0.0 }
 0x1d6   : > { %v1315_v14 = vsub.f32 %v1204_v49, %v1306_v46  ;;  %v1317_v24 = vsub.f32 %v1206_v48, %v1306_v46  ;;  %2174 = vmatmul.msk.bf16.gmra.mxu2 %vm1017_vm2, %v2163_v56  ;;  %v2851_v48 = vld [vmem:[%s3235_s9 + $0x8] sm:$0xff] }
 0x1d8   : > { %v1319_v51 = vmul.f32 1.442695, %v1315_v14  ;;  %v1323_v52 = vmul.f32 1.442695, %v1317_v24 }
 0x1d9   : > { %v2797_v36 = vpop.f32.mrf.mxu2 }
 0x1da   : > { %2268 = vpow2.f32 %v1319_v51  ;;  %1145 = vmatmul.bf16.gmra.mxu3 %v1009_v16  ;;  %v2819_v16 = vld [vmem:[%s3234_s8] sm:$0xff]  ;;  %v2887_v51 = vld [vmem:[%s3235_s9 + $0x18] sm:$0xff] }
 0x1db   : > { %2270 = vpow2.f32 %v1323_v52 }
 0x1dd   : > { %v2799_v9 = vpop.f32.mrf.mxu3 }
 0x1e0   : > { %v2269_v1 = vpop.eup %2268 }
 0x1e1   : > { %v2271_v31 = vpop.eup %2270  ;;  %v1057_v3 = vpop.f32.mrf.mxu2 }
 0x1e2   : > { %v1327_v62 = vsel %vm1298_vm5, %v2271_v31, 0.0  ;;  %v2802_v37 = vadd.f32 %v1095_v47, %v1057_v3  ;;  %v2880_v47 = vld [vmem:[%s3234_s8 + $0x20] sm:$0xff] }
 0x1e3   : > { %v1328_v60 = vadd.f32 %v2269_v1, %v1327_v62 }
 0x1e5   : > { %v1329_v63 = vrot.slane %v1328_v60, 4  ;;  %v1100_v20 = vpop.f32.mrf.mxu3 }
 0x1e6   : > { %2175 = vmatmul.msk.bf16.gmra.mxu2 %vm1017_vm2, %v2750_v26 }
 0x1e7   : > { %v1330_v21 = vadd.f32 %v1329_v63, %v1328_v60 }
 0x1e9   : > { %v1331_v13 = vrot.slane %v1330_v21, 2  ;;  %v2806_v53 = vpop.f32.mrf.mxu2 }
 0x1eb   : > { %v1332_v54 = vadd.f32 %v1331_v13, %v1330_v21  ;;  %v2910_v21 = vld [vmem:[%s3235_s9 + $0x20] sm:$0xf] }
 0x1ed   : > { %v1103_v6 = vpop.f32.mrf.mxu3  ;;  %v1333_v8 = vrot.slane %v1332_v54, 1 }
 0x1ef   : > { %v1334_v12 = vadd.f32 %v1333_v8, %v1332_v54 }
 0x1f1   : > { %v1062_v41 = vpop.f32.mrf.mxu2  ;;  %2272 = vrcp.f32 %v1334_v12 }
 0x1f2   : > { %v2808_v17 = vadd.f32 %v1100_v20, %v1062_v41  ;;  %v2919_v41 = vld [vmem:[%s3234_s8 + $0x30] sm:$0xff] }
 0x1f5   : > { %v1105_v43 = vpop.f32.mrf.mxu3 }
 0x1f7   : > { %v2273_v4 = vpop.eup %2272 }
 0x1f8   : > { %v1345_v45 = vmul.f32 %v2273_v4, %v1334_v12 }
 0x1f9   : > { %v1065_v55 = vpop.f32.mrf.mxu2 }
 0x1fa   : > { %v2810_v56 = vadd.f32 %v1103_v6, %v1065_v55  ;;  %v1347_v57 = vsub.f32 2.0, %v1345_v45 }
 0x1fc   : > { %v1349_v59 = vmul.f32 %v2273_v4, %v1347_v57 }
 0x1fd   : > { %v1108_v10 = vpop.f32.mrf.mxu3 }
 0x1fe   : > { %v1353_v25 = vmul.f32 %v2271_v31, %v1349_v59  ;;  %v1351_v26 = vmul.f32 %v2269_v1, %v1349_v59 }
 0x200   : > { %2198 = vmatpush.msk.msra.mxu3 %vm1298_vm5, %v1353_v25  ;;  %v1357_v2 = vsel %vm569_vm3, %v1353_v25, 0.0 }
 0x201   : > { %2176 = vmatpush.msk.msrb.mxu0 %vm1298_vm5, %v1357_v2  ;;  %v1067_v11 = vpop.f32.mrf.mxu2 }
 0x202   : > { %v2821_v35 = vadd.f32 %v1105_v43, %v1067_v11  ;;  %1531 = vmatpush.msra.mxu3 %v1351_v26 }
 0x203   : > { %2177 = vmatpush.msk.msrb.mxu0 %vm567_vm4, %v1351_v26  ;;  %2199 = vmatmul.msk.f32.vlgmr.msra.gmra.mxu3 %vm1368_vm6, %v2837_v30  ;;  %v2928_v26 = vld [vmem:[%s3234_s8 + $0x38] sm:$0xff] }
 0x204   : > { %2178 = vmatmul.msk.f32.vlgmr.msrb.gmra.mxu0 %vm1368_vm6, %v2819_v16 }
 0x205   : > { %v1110_v39 = vpop.f32.mrf.mxu3 }
 0x209   : > { %v1070_v27 = vpop.f32.mrf.mxu2 }
 0x20a   : > { %v2832_v29 = vadd.f32 %v1108_v10, %v1070_v27 }
 0x20b   : > { %2200 = vmatmul.msk.f32.gmra.mxu3 %vm1368_vm6, %v2851_v48 }
 0x20c   : > { %2179 = vmatmul.msk.f32.gmra.mxu0 %vm1368_vm6, %v2830_v15 }
 0x20d   : > { %v1121_v33 = vpop.f32.mrf.mxu3 }
 0x211   : > { %v1072_v42 = vpop.f32.mrf.mxu2 }
 0x213   : > { %2201 = vmatmul.msk.f32.gmra.mxu3 %vm1368_vm6, %v2865_v34 }
 0x214   : > { %2180 = vmatmul.msk.f32.gmra.mxu0 %vm1368_vm6, %v2846_v61 }
 0x215   : > { %v1123_v49 = vpop.f32.mrf.mxu3 }
 0x219   : > { %v1159_v22 = vpop.f32.mrf.mxu2 }
 0x21a   : > { %v1160_v23 = vadd.f32 %v1159_v22, %v1121_v33 }
 0x21b   : > { %2202 = vmatmul.msk.f32.gmra.mxu3 %vm1368_vm6, %v2887_v51 }
 0x21c   : > { %2181 = vmatmul.msk.f32.gmra.mxu0 %vm1368_vm6, %v2860_v58  ;;  %v1201_v24 = vadd.f32 %v2774_v32, %v1160_v23 }
 0x21d   : > { %v1126_v18 = vpop.f32.mrf.mxu3 }
 0x21e   : > { %v1205_v31 = vsel %vm568_vm8, %v1201_v24, 0.0 }
 0x221   : > { %v1161_v46 = vpop.f32.mrf.mxu2 }
 0x222   : > { %v1162_v14 = vadd.f32 %v1161_v46, %v1123_v49  ;;  %v2937_v49 = vld [vmem:[%s3234_s8 + $0x40] sm:$0xff] }
 0x223   : > { %2203 = vmatmul.msk.f32.gmra.mxu3 %vm1368_vm6, %v2910_v21 }
 0x224   : > { %v1203_v52 = vadd.f32 %v2776_v40, %v1162_v14  ;;  %2182 = vmatmul.msk.f32.gmra.mxu0 %vm1368_vm6, %v2880_v47  ;;  %v2903_v40 = vld [vmem:[%s3234_s8 + $0x28] sm:$0xff] }
 0x225   : > { %v1128_v1 = vpop.f32.mrf.mxu3 }
 0x226   : > { %v1207_v32 = vsel %vm570_vm7, %v1203_v52, 0.0 }
 0x227   : > { %v1307_v3 = vsel %vm1298_vm5, %v1207_v32, -inf }
 0x228   : > { %v1308_v62 = vmax.f32 %v1205_v31, %v1307_v3 }
 0x229   : > { %v1164_v60 = vpop.f32.mrf.mxu2 }
 0x22a   : > { %v1309_v63 = vrot.slane %v1308_v62, 4  ;;  %v2905_v20 = vadd.f32 %v1164_v60, %v1126_v18 }
 0x22c   : > { %v1310_v13 = vmax.f32 %v1308_v62, %v1309_v63  ;;  %2183 = vmatmul.msk.f32.gmra.mxu0 %vm1368_vm6, %v2903_v40 }
 0x22d   : > { %v1131_v54 = vpop.f32.mrf.mxu3 }
 0x22e   : > { %v1311_v6 = vrot.slane %v1310_v13, 2 }
 0x230   : > { %v1312_v8 = vmax.f32 %v1310_v13, %v1311_v6 }
 0x231   : > { %v1166_v12 = vpop.f32.mrf.mxu2 }
 0x232   : > { %v1313_v43 = vrot.slane %v1312_v8, 1  ;;  %v2921_v4 = vadd.f32 %v1166_v12, %v1128_v1 }
 0x234   : > { %v1314_v45 = vmax.f32 %v1312_v8, %v1313_v43  ;;  %2184 = vmatmul.msk.f32.gmra.mxu0 %vm1368_vm6, %v2919_v41 }
 0x235   : > { %v1133_v55 = vpop.f32.mrf.mxu3 }
 0x236   : > { %v1316_v57 = vsub.f32 %v1205_v31, %v1314_v45  ;;  %v1318_v59 = vsub.f32 %v1207_v32, %v1314_v45 }
 0x238   : > { %v1321_v10 = vmul.f32 1.442695, %v1316_v57  ;;  %v1325_v25 = vmul.f32 1.442695, %v1318_v59 }
 0x239   : > { %v1169_v2 = vpop.f32.mrf.mxu2 }
 0x23a   : > { %2274 = vpow2.f32 %v1321_v10  ;;  %v2930_v11 = vadd.f32 %v1169_v2, %v1131_v54 }
 0x23b   : > { %2276 = vpow2.f32 %v1325_v25 }
 0x23c   : > { %2185 = vmatmul.msk.f32.gmra.mxu0 %vm1368_vm6, %v2928_v26 }
 0x23d   : > { %v1136_v39 = vpop.f32.mrf.mxu3 }
 0x240   : > { %v2275_v27 = vpop.eup %2274 }
 0x241   : > { %v2277_v33 = vpop.eup %2276  ;;  %v1171_v42 = vpop.f32.mrf.mxu2 }
 0x242   : > { %v1335_v22 = vsel %vm1298_vm5, %v2277_v33, 0.0  ;;  %v2940_v18 = vadd.f32 %v1171_v42, %v1133_v55 }
 0x243   : > { %v1336_v23 = vadd.f32 %v2275_v27, %v1335_v22  ;;  %v2970_v22 = vpop.permute.xlu1 %1254 }
 0x244   : > { %2186 = vmatmul.msk.f32.gmra.mxu0 %vm1368_vm6, %v2937_v49 }
 0x245   : > { %v1337_v46 = vrot.slane %v1336_v23, 4  ;;  %v1138_v14 = vpop.f32.mrf.mxu3 }
 0x247   : > { %v1338_v24 = vadd.f32 %v1337_v46, %v1336_v23 }
 0x249   : > { %v1339_v52 = vrot.slane %v1338_v24, 2  ;;  %v1174_v1 = vpop.f32.mrf.mxu2 }
 0x24a   : > { %v2944_v32 = vadd.f32 %v1174_v1, %v1136_v39  ;;  %v3010_v1 = vpop.permute.xlu2 %1259 }
 0x24b   : > { %v1340_v31 = vadd.f32 %v1339_v52, %v1338_v24 }
 0x24d   : > { %v1141_v3 = vpop.f32.mrf.mxu3  ;;  %v1341_v62 = vrot.slane %v1340_v31, 1 }
 0x24f   : > { %v1342_v60 = vadd.f32 %v1341_v62, %v1340_v31  ;;  %v1099_v62 = vadd.f32 %v2799_v9, %v2806_v53 }
 0x251   : > { %v1176_v63 = vpop.f32.mrf.mxu2  ;;  %2278 = vrcp.f32 %v1342_v60 }
 0x252   : > { %v2946_v13 = vadd.f32 %v1176_v63, %v1138_v14 }
 0x255   : > { %v1143_v54 = vpop.f32.mrf.mxu3 }
 0x257   : > { %v2279_v6 = vpop.eup %2278 }
 0x258   : > { %v1346_v8 = vmul.f32 %v2279_v6, %v1342_v60 }
 0x259   : > { %v1179_v12 = vpop.f32.mrf.mxu2 }
 0x25a   : > { %v2948_v43 = vadd.f32 %v1179_v12, %v1141_v3  ;;  %v1348_v45 = vsub.f32 2.0, %v1346_v8  ;;  %v3029_v12 = vld [vmem:[%s530_s24 + $0x10] sm:$0xff] }
 0x25c   : > { %v1350_v55 = vmul.f32 %v2279_v6, %v1348_v45  ;;  %v3031_v45 = vld [vmem:[%s530_s24 + $0x18] sm:$0xff] }
 0x25d   : > { %v1146_v57 = vpop.f32.mrf.mxu3 }
 0x25e   : > { %v1354_v59 = vmul.f32 %v2277_v33, %v1350_v55  ;;  %v1352_v25 = vmul.f32 %v2275_v27, %v1350_v55  ;;  %v2968_v27 = vpop.permute.xlu0 %1249  ;;  %v3033_v55 = vld [vmem:[%s530_s24 + $0x20] sm:$0x33] }
 0x260   : > { %2204 = vmatpush.msk.msra.mxu2 %vm1298_vm5, %v1354_v59  ;;  %v1358_v10 = vsel %vm570_vm7, %v1354_v59, 0.0  ;;  %v1617_v59 = vunpack.c.l.bf16 %v3029_v12 }
 0x261   : > { %2187 = vmatpush.msk.msrb.mxu1 %vm1298_vm5, %v1358_v10  ;;  %v1181_v2 = vpop.f32.mrf.mxu2  ;;  %v1619_v10 = vunpack.c.l.bf16 %v3031_v45 }
 0x262   : > { %v2954_v39 = vadd.f32 %v1181_v2, %v1143_v54  ;;  %1563 = vmatpush.msra.mxu2 %v1352_v25 }
 0x263   : > { %2188 = vmatpush.msk.msrb.mxu1 %vm568_vm8, %v1352_v25  ;;  %2205 = vmatmul.msk.f32.vlgmr.msra.gmra.mxu2 %vm1368_vm6, %v2837_v30  ;;  %v2978_v30 = vpop.permute.xlu1 %1229  ;;  %v3040_v25 = vld [vmem:[%s530_s24 + $0x8] sm:$0xff] }
 0x264   : > { %2189 = vmatmul.msk.f32.vlgmr.msrb.gmra.mxu1 %vm1368_vm6, %v2819_v16 }
 0x265   : > { %v1148_v33 = vpop.f32.mrf.mxu3 }
 0x266   : > { %v2976_v16 = vpop.permute.xlu0 %1244 }
 0x269   : > { %v1184_v42 = vpop.f32.mrf.mxu2 }
 0x26a   : > { %v2962_v50 = vadd.f32 %v1184_v42, %v1146_v57  ;;  %v3036_v57 = vld [vmem:[%s530_s24] sm:$0xff] }
 0x26b   : > { %2206 = vmatmul.msk.f32.gmra.mxu2 %vm1368_vm6, %v2851_v48  ;;  %v1091_v48 = vadd.f32 %v2782_v44, %v2794_v5  ;;  %v1613_v33 = vunpack.c.l.bf16 %v3036_v57 }
 0x26c   : > { %2190 = vmatmul.msk.f32.gmra.mxu1 %vm1368_vm6, %v2830_v15  ;;  %v1089_v15 = vadd.f32 %v2759_v28, %v2790_v38 }
 0x26e   : > { %v2988_v46 = vpop.permute.xlu0 %1219 }
 0x26f   : > { %v1262_v14 = vadd.f32 %v2988_v46, %v1089_v15  ;;  %v1615_v15 = vunpack.c.l.bf16 %v3040_v25 }
 0x271   : > { %v1186_v23 = vpop.f32.mrf.mxu2 }
 0x273   : > { %2207 = vmatmul.msk.f32.gmra.mxu2 %vm1368_vm6, %v2865_v34 }
 0x274   : > { %2191 = vmatmul.msk.f32.gmra.mxu1 %vm1368_vm6, %v2846_v61  ;;  %v2990_v61 = vpop.permute.xlu1 %1224 }
 0x27b   : > { %2208 = vmatmul.msk.f32.gmra.mxu2 %vm1368_vm6, %v2887_v51  ;;  %v1280_v51 = vmax.f32 %v1262_v14, 0.0 }
 0x27c   : > { %2192 = vmatmul.msk.f32.gmra.mxu1 %vm1368_vm6, %v2860_v58  ;;  %v1264_v58 = vadd.f32 %v2990_v61, %v1091_v48 }
 0x27e   : > { %v1282_v28 = vmax.f32 %v1264_v58, 0.0  ;;  %v1274_v58 = vadd.f32 %v2968_v27, %v2810_v56 }
 0x281   : > { %v1419_v34 = vpop.f32.mrf.mxu0 }
 0x282   : > { %v2998_v24 = vmul.f32 %v1419_v34, %v1280_v51  ;;  %v1276_v51 = vadd.f32 %v2970_v22, %v2821_v35  ;;  %v3054_v35 = vld [vmem:[%s3237_s11] sm:$0xff] }
 0x283   : > { %2209 = vmatmul.msk.f32.gmra.mxu2 %vm1368_vm6, %v2910_v21 }
 0x284   : > { %2193 = vmatmul.msk.f32.gmra.mxu1 %vm1368_vm6, %v2880_v47 }
 0x286   : > { %v1533_v21 = vpop.f32.mrf.mxu3 }
 0x289   : > { %v1422_v38 = vpop.f32.mrf.mxu0 }
 0x28a   : > { %v3000_v44 = vmul.f32 %v1422_v38, %v1282_v28  ;;  %v1623_v38 = vmul.f32 %v1613_v33, %v1533_v21 }
 0x28c   : > { %v1598_v5 = vpack.c.bf16 %v3000_v44, %v2998_v24  ;;  %2194 = vmatmul.msk.f32.gmra.mxu1 %vm1368_vm6, %v2903_v40  ;;  %v3018_v40 = vpop.permute.xlu2 %1239 }
 0x28d   : > { %v1270_v63 = vadd.f32 %v3018_v40, %v1099_v62 }
 0x28e   : > { %v1536_v47 = vpop.f32.mrf.mxu3 }
 0x28f   : > { %v1288_v6 = vmax.f32 %v1270_v63, 0.0  ;;  %v1625_v62 = vmul.f32 %v1615_v15, %v1536_v47  ;;  %v1292_v63 = vmax.f32 %v1274_v58, 0.0 }
 0x291   : > { %v3006_v52 = vpop.f32.mrf.mxu0 }
 0x294   : > { %2195 = vmatmul.msk.f32.gmra.mxu1 %vm1368_vm6, %v2919_v41  ;;  %v1272_v41 = vadd.f32 %v2976_v16, %v2808_v17 }
 0x296   : > { %v1539_v3 = vpop.f32.mrf.mxu3  ;;  %v1290_v8 = vmax.f32 %v1272_v41, 0.0  ;;  %v1294_v41 = vmax.f32 %v1276_v51, 0.0 }
 0x297   : > { %v1627_v48 = vmul.f32 %v1617_v59, %v1539_v3  ;;  %v1235_v59 = vpop.permute.xlu2 %1234 }
 0x299   : > { %v3012_v31 = vpop.f32.mrf.mxu0 }
 0x29c   : > { %2196 = vmatmul.msk.f32.gmra.mxu1 %vm1368_vm6, %v2928_v26 }
 0x29e   : > { %v1542_v54 = vpop.f32.mrf.mxu3 }
 0x29f   : > { %v1629_v34 = vmul.f32 %v1619_v10, %v1542_v54  ;;  %v1268_v10 = vadd.f32 %v1235_v59, %v2802_v37 }
 0x2a1   : > { %v1431_v60 = vpop.f32.mrf.mxu0  ;;  %v1286_v33 = vmax.f32 %v1268_v10, 0.0 }
 0x2a2   : > { %v1588_v53 = vmul.f32 %v1431_v60, %v1288_v6  ;;  %v1635_v60 = vpack.c.bf16 %v1629_v34, %v1627_v48  ;;  %v1633_v6 = vpack.c.bf16 %v1625_v62, %v1623_v38 }
 0x2a4   : > { %2197 = vmatmul.msk.f32.gmra.mxu1 %vm1368_vm6, %v2937_v49  ;;  %v1621_v49 = vunpack.c.l.bf16 %v3033_v55 }
 0x2a6   : > { %v1545_v2 = vpop.f32.mrf.mxu3 }
 0x2a7   : > { %v1631_v42 = vmul.f32 %v1621_v49, %v1545_v2  ;;  %v1094_v49 = vadd.f32 %v2792_v19, %v2797_v36  ;;  %v3068_v19 = vld [vmem:[%s3236_s10] sm:$0xff]  ;;  %v1263_v36 = vadd.f32 %v2988_v46, %v2905_v20  ;;  %v1269_v20 = vadd.f32 %v1235_v59, %v2940_v18 }
 0x2a8   : > { %v1620_v18 = vunpack.c.h.bf16 %v3031_v45 }
 0x2a9   : > { %v1434_v9 = vpop.f32.mrf.mxu0  ;;  %v1637_v14 = vpack.c.bf16 %v1631_v42, %v1631_v42  ;;  %v1266_v2 = vadd.f32 %v2978_v30, %v1094_v49  ;;  %v1281_v37 = vmax.f32 %v1263_v36, 0.0  ;;  %v1287_v62 = vmax.f32 %v1269_v20, 0.0 }
 0x2aa   : > { %v1590_v26 = vmul.f32 %v1434_v9, %v1290_v8  ;;  %v1278_v9 = vadd.f32 %v3010_v1, %v2832_v29  ;;  %v1279_v36 = vadd.f32 %v3010_v1, %v2962_v50 }
 0x2ab   : > { %v1653_v28 = vsel %vm1651_vm9, %v1637_v14, 0  ;;  %v1284_v42 = vmax.f32 %v1266_v2, 0.0 }
 0x2ac   : > { %v1602_v17 = vpack.c.bf16 %v1590_v26, %v1588_v53  ;;  %1663 = vmatpush.bf16.msra.mxu0 %v1653_v28  ;;  %v1296_v21 = vmax.f32 %v1278_v9, 0.0  ;;  %v1267_v28 = vadd.f32 %v2978_v30, %v2930_v11  ;;  %v1618_v11 = vunpack.c.h.bf16 %v3029_v12 }
 0x2ad   : > { %v1584_v15 = vmul.f32 %v3006_v52, %v1284_v42  ;;  %v1277_v42 = vadd.f32 %v2970_v22, %v2954_v39 }
 0x2ae   : > { %v1285_v38 = vmax.f32 %v1267_v28, 0.0 }
 0x2b0   : > { %1664 = vmatpush.bf16.msra.mxu0 %v1635_v60 }
 0x2b1   : > { %v1437_v23 = vpop.f32.mrf.mxu0 }
 0x2b2   : > { %v1592_v3 = vmul.f32 %v1437_v23, %v1292_v63  ;;  %v1586_v23 = vmul.f32 %v3012_v31, %v1286_v33  ;;  %v1275_v33 = vadd.f32 %v2968_v27, %v2948_v43 }
 0x2b4   : > { %1665 = vmatpush.bf16.msra.mxu0 %v1633_v6  ;;  %v1600_v48 = vpack.c.bf16 %v1586_v23, %v1584_v15 }
 0x2b7   : > { %2214 = vmatmul.msk.bf16.vlgmr.msra.gmra.mxu0 %vm697_vm1, %v3054_v35 }
 0x2b9   : > { %v1440_v8 = vpop.f32.mrf.mxu0 }
 0x2ba   : > { %v1594_v54 = vmul.f32 %v1440_v8, %v1294_v41  ;;  %v1622_v8 = vunpack.c.h.bf16 %v3033_v55 }
 0x2bc   : > { %v1604_v56 = vpack.c.bf16 %v1594_v54, %v1592_v3  ;;  %v1271_v3 = vadd.f32 %v3018_v40, %v2944_v32  ;;  %v1273_v54 = vadd.f32 %v2976_v16, %v2946_v13  ;;  %v1616_v32 = vunpack.c.h.bf16 %v3040_v25 }
 0x2bd   : > { %v1295_v25 = vmax.f32 %v1277_v42, 0.0 }
 0x2c1   : > { %v1443_v47 = vpop.f32.mrf.mxu0 }
 0x2c2   : > { %v1596_v53 = vmul.f32 %v1443_v47, %v1296_v21  ;;  %v1291_v21 = vmax.f32 %v1273_v54, 0.0 }
 0x2c4   : > { %v1606_v26 = vpack.c.bf16 %v1596_v53, %v1596_v53 }
 0x2c6   : > { %v1696_v29 = vsel %vm752_vm0, %v1606_v26, 0 }
 0x2c7   : > { %1704 = vmatpush.bf16.msrb.mxu3 %v1696_v29  ;;  %v1614_v29 = vunpack.c.h.bf16 %v3036_v57  ;;  %v1293_v57 = vmax.f32 %v1275_v33, 0.0 }
 0x2cb   : > { %1705 = vmatpush.bf16.msrb.mxu3 %v1604_v56  ;;  %v1289_v56 = vmax.f32 %v1271_v3, 0.0 }
 0x2cf   : > { %1706 = vmatpush.bf16.msrb.mxu3 %v1602_v17  ;;  %v1265_v17 = vadd.f32 %v2990_v61, %v2921_v4 }
 0x2d1   : > { %v1283_v14 = vmax.f32 %v1265_v17, 0.0 }
 0x2d3   : > { %1707 = vmatpush.bf16.msrb.mxu3 %v1600_v48 }
 0x2d7   : > { %1708 = vmatpush.bf16.msrb.mxu3 %v1598_v5 }
 0x2da   : > { %2220 = vmatmul.msk.bf16.vlgmr.msrb.gmra.mxu3 %vm1691_vm10, %v3068_v19 }
 0x2e1   : > { %v1463_v52 = vpop.f32.mrf.mxu1 }
 0x2e2   : > { %v3077_v31 = vmul.f32 %v1463_v52, %v1281_v37  ;;  %v1297_v52 = vmax.f32 %v1279_v36, 0.0 }
 0x2e6   : > { %v1565_v34 = vpop.f32.mrf.mxu2 }
 0x2e7   : > { %v1624_v12 = vmul.f32 %v1614_v29, %v1565_v34  ;;  %v3106_v34 = vpop.permute.xlu2 %1733 }
 0x2e9   : > { %v1466_v58 = vpop.f32.mrf.mxu1 }
 0x2ea   : > { %v1583_v51 = vmul.f32 %v1466_v58, %v1283_v14 }
 0x2ec   : > { %v1599_v24 = vpack.c.bf16 %v1583_v51, %v3077_v31 }
 0x2ee   : > { %v1568_v44 = vpop.f32.mrf.mxu2 }
 0x2ef   : > { %v1626_v45 = vmul.f32 %v1616_v32, %v1568_v44 }
 0x2f1   : > { %v1469_v5 = vpop.f32.mrf.mxu1  ;;  %v1634_v2 = vpack.c.bf16 %v1626_v45, %v1624_v12 }
 0x2f2   : > { %v1585_v63 = vmul.f32 %v1469_v5, %v1285_v38 }
 0x2f6   : > { %v1571_v46 = vpop.f32.mrf.mxu2 }
 0x2f7   : > { %v1628_v47 = vmul.f32 %v1618_v11, %v1571_v46 }
 0x2f9   : > { %v1472_v60 = vpop.f32.mrf.mxu1 }
 0x2fa   : > { %v1587_v41 = vmul.f32 %v1472_v60, %v1287_v62 }
 0x2fc   : > { %v1601_v4 = vpack.c.bf16 %v1587_v41, %v1585_v63 }
 0x2fe   : > { %v1574_v61 = vpop.f32.mrf.mxu2 }
 0x2ff   : > { %v1630_v53 = vmul.f32 %v1620_v18, %v1574_v61 }
 0x301   : > { %v1475_v6 = vpop.f32.mrf.mxu1  ;;  %v1636_v40 = vpack.c.bf16 %v1630_v53, %v1628_v47 }
 0x302   : > { %v1589_v59 = vmul.f32 %v1475_v6, %v1289_v56 }
 0x306   : > { %v1577_v30 = vpop.f32.mrf.mxu2 }
 0x307   : > { %v1632_v9 = vmul.f32 %v1622_v8, %v1577_v30  ;;  %v3119_v8 = vpop.permute.xlu0 %1738 }
 0x309   : > { %v1478_v26 = vpop.f32.mrf.mxu1  ;;  %v1638_v49 = vpack.c.bf16 %v1632_v9, %v1632_v9 }
 0x30a   : > { %v1591_v55 = vmul.f32 %v1478_v26, %v1291_v21 }
 0x30b   : > { %v1656_v13 = vsel %vm1651_vm9, %v1638_v49, 0 }
 0x30c   : > { %v1603_v16 = vpack.c.bf16 %v1591_v55, %v1589_v59  ;;  %1677 = vmatpush.bf16.msra.mxu1 %v1656_v13 }
 0x310   : > { %1678 = vmatpush.bf16.msra.mxu1 %v1636_v40 }
 0x311   : > { %v1481_v10 = vpop.f32.mrf.mxu1 }
 0x312   : > { %v1593_v15 = vmul.f32 %v1481_v10, %v1293_v57 }
 0x314   : > { %1679 = vmatpush.bf16.msra.mxu1 %v1634_v2 }
 0x317   : > { %2215 = vmatmul.msk.bf16.vlgmr.msra.gmra.mxu1 %vm697_vm1, %v3054_v35  ;;  %vm1900_vm1 = vcmask 1047559  }
 0x319   : > { %v1484_v23 = vpop.f32.mrf.mxu1 }
 0x31a   : > { %v1595_v48 = vmul.f32 %v1484_v23, %v1295_v25 }
 0x31c   : > { %v1605_v37 = vpack.c.bf16 %v1595_v48, %v1593_v15 }
 0x321   : > { %v1487_v31 = vpop.f32.mrf.mxu1 }
 0x322   : > { %v1597_v17 = vmul.f32 %v1487_v31, %v1297_v52 }
 0x324   : > { %v1607_v43 = vpack.c.bf16 %v1597_v17, %v1597_v17 }
 0x326   : > { %v1699_v27 = vsel %vm752_vm0, %v1607_v43, 0  ;;  %vm1897_vm0 = vcmask 1046534  }
 0x327   : > { %1718 = vmatpush.bf16.msrb.mxu0 %v1699_v27 }
 0x32b   : > { %1719 = vmatpush.bf16.msrb.mxu0 %v1605_v37 }
 0x32f   : > { %1720 = vmatpush.bf16.msrb.mxu0 %v1603_v16 }
 0x333   : > { %1721 = vmatpush.bf16.msrb.mxu0 %v1601_v4 }
 0x334   : > { %v1667_v39 = vpop.f32.mrf.mxu0 }
 0x337   : > { %1722 = vmatpush.bf16.msrb.mxu0 %v1599_v24 }
 0x33a   : > { %2221 = vmatmul.msk.bf16.vlgmr.msrb.gmra.mxu0 %vm1691_vm10, %v3068_v19 }
 0x33c   : > { %v1669_v46 = vpop.f32.mrf.mxu0 }
 0x35d   : > { %v1710_v22 = vpop.f32.mrf.mxu3 }
 0x35e   : > { %v1711_v35 = vadd.f32 %v1710_v22, %v1667_v39 }
 0x360   : > { %v1741_v50 = vadd.f32 %v3106_v34, %v1711_v35 }
 0x362   : > { %v1745_v1 = vmax.f32 %v1741_v50, 0.0 }
 0x364   : > { %v1757_v14 = vrot.slane %v1745_v1, 4  ;;  %v1759_v58 = vrot.slane %v1745_v1, 5  ;;  %v1761_v51 = vrot.slane %v1745_v1, 6  ;;  %v1763_v44 = vrot.slane %v1745_v1, 7 }
 0x365   : > { %v1765_v5 = vrot.slane %v1745_v1, 1  ;;  %v1767_v28 = vrot.slane %v1745_v1, 2  ;;  %v1712_v38 = vpop.f32.mrf.mxu3  ;;  %v1769_v62 = vrot.slane %v1745_v1, 3  ;;  %v1825_v56 = vsel %vm567_vm4, %v1745_v1, 0.0 }
 0x366   : > { %v1817_v24 = vsel %vm567_vm4, %v1757_v14, 0.0  ;;  %v1819_v19 = vsel %vm567_vm4, %v1759_v58, 0.0  ;;  %v1821_v20 = vsel %vm567_vm4, %v1761_v51, 0.0  ;;  %v1823_v60 = vsel %vm567_vm4, %v1763_v44, 0.0 }
 0x367   : > { %v1881_v63 = vrot.slane %v1817_v24, 4  ;;  %v1882_v41 = vrot.slane %v1819_v19, 3  ;;  %v1885_v4 = vrot.slane %v1821_v20, 2  ;;  %v1827_v61 = vsel %vm567_vm4, %v1765_v5, 0.0 }
 0x368   : > { %v1713_v6 = vadd.f32 %v1712_v38, %v1669_v46  ;;  %v1829_v3 = vsel %vm567_vm4, %v1767_v28, 0.0  ;;  %v1888_v11 = vrot.slane %v1823_v60, 1  ;;  %v1831_v18 = vsel %vm567_vm4, %v1769_v62, 0.0 }
 0x369   : > { %v1884_v54 = vsel %vm1883_vm11, %v1882_v41, %v1881_v63  ;;  %v1893_v47 = vrot.slane %v1827_v61, 7  ;;  %v1896_v26 = vrot.slane %v1829_v3, 6  ;;  %v1899_v55 = vrot.slane %v1831_v18, 5 }
 0x36a   : > { %v1887_v30 = vsel %vm1886_vm12, %v1885_v4, %v1884_v54  ;;  %v1743_v9 = vadd.f32 %v3119_v8, %v1713_v6 }
 0x36b   : > { %v1890_v21 = vsel %vm1889_vm13, %v1888_v11, %v1887_v30 }
 0x36c   : > { %v1892_v53 = vsel %vm1891_vm14, %v1825_v56, %v1890_v21  ;;  %v1747_v49 = vmax.f32 %v1743_v9, 0.0 }
 0x36d   : > { %v1895_v59 = vsel %vm1894_vm15, %v1893_v47, %v1892_v53 }
 0x36e   : > { %v1898_v29 = vsel %vm1897_vm0, %v1896_v26, %v1895_v59  ;;  %v1771_v32 = vrot.slane %v1747_v49, 4  ;;  %v1773_v13 = vrot.slane %v1747_v49, 5  ;;  %v1775_v16 = vrot.slane %v1747_v49, 6 }
 0x36f   : > { %v1901_v40 = vsel %vm1900_vm1, %v1899_v55, %v1898_v29  ;;  %v1777_v12 = vrot.slane %v1747_v49, 7  ;;  %v1779_v45 = vrot.slane %v1747_v49, 1  ;;  %v1781_v10 = vrot.slane %v1747_v49, 2 }
 0x370   : > { %1948 = vst [vmem:[%s3137_s20] sm:$0xff] %v1901_v40  ;;  %v1833_v2 = vsel %vm567_vm4, %v1771_v32, 0.0  ;;  %v1835_v33 = vsel %vm567_vm4, %v1773_v13, 0.0  ;;  %v1837_v42 = vsel %vm567_vm4, %v1775_v16, 0.0  ;;  %v1783_v57 = vrot.slane %v1747_v49, 3 }
 0x371   : > { %v1839_v25 = vsel %vm567_vm4, %v1777_v12, 0.0  ;;  %v1916_v23 = vrot.slane %v1833_v2, 4  ;;  %v1917_v15 = vrot.slane %v1835_v33, 3  ;;  %v1919_v48 = vrot.slane %v1837_v42, 2 }
 0x372   : > { %v1843_v36 = vsel %vm567_vm4, %v1779_v45, 0.0  ;;  %v1845_v37 = vsel %vm567_vm4, %v1781_v10, 0.0  ;;  %v1921_v31 = vrot.slane %v1839_v25, 1  ;;  %v1847_v17 = vsel %vm567_vm4, %v1783_v57, 0.0 }
 0x373   : > { %v1918_v52 = vsel %vm1883_vm11, %v1917_v15, %v1916_v23  ;;  %v1841_v27 = vsel %vm567_vm4, %v1747_v49, 0.0  ;;  %v1924_v22 = vrot.slane %v1843_v36, 7  ;;  %v1926_v50 = vrot.slane %v1845_v37, 6 }
 0x374   : > { %v1920_v43 = vsel %vm1886_vm12, %v1919_v48, %v1918_v52  ;;  %v1928_v14 = vrot.slane %v1847_v17, 5 }
 0x375   : > { %v1922_v39 = vsel %vm1889_vm13, %v1921_v31, %v1920_v43 }
 0x376   : > { %v1923_v35 = vsel %vm1891_vm14, %v1841_v27, %v1922_v39 }
 0x377   : > { %v1925_v1 = vsel %vm1894_vm15, %v1924_v22, %v1923_v35 }
 0x378   : > { %v1927_v58 = vsel %vm1897_vm0, %v1926_v50, %v1925_v1 }
 0x379   : > { %v1929_v51 = vsel %vm1900_vm1, %v1928_v14, %v1927_v58 }
 0x37a   : > { %1950 = vst [vmem:[%s3137_s20 + $0x10] sm:$0xff] %v1929_v51 }
 0x394   : > { %v1681_v44 = vpop.f32.mrf.mxu1 }
 0x39c   : > { %v1683_v18 = vpop.f32.mrf.mxu1 }
 0x3b7   : > { %v1724_v5 = vpop.f32.mrf.mxu0 }
 0x3b8   : > { %v1725_v28 = vadd.f32 %v1724_v5, %v1681_v44 }
 0x3ba   : > { %v1742_v0 = vadd.f32 %v3106_v34, %v1725_v28 }
 0x3bc   : > { %v1746_v24 = vmax.f32 %v1742_v0, 0.0 }
 0x3be   : > { %v1758_v19 = vrot.slane %v1746_v24, 4  ;;  %v1760_v20 = vrot.slane %v1746_v24, 5  ;;  %v1762_v46 = vrot.slane %v1746_v24, 6  ;;  %v1764_v38 = vrot.slane %v1746_v24, 7 }
 0x3bf   : > { %v1766_v62 = vrot.slane %v1746_v24, 1  ;;  %v1768_v60 = vrot.slane %v1746_v24, 2  ;;  %v1726_v61 = vpop.f32.mrf.mxu0  ;;  %v1770_v6 = vrot.slane %v1746_v24, 3  ;;  %v1826_v59 = vsel %vm568_vm8, %v1746_v24, 0.0 }
 0x3c0   : > { %v1818_v63 = vsel %vm568_vm8, %v1758_v19, 0.0  ;;  %v1820_v41 = vsel %vm568_vm8, %v1760_v20, 0.0  ;;  %v1822_v4 = vsel %vm568_vm8, %v1762_v46, 0.0  ;;  %v1824_v34 = vsel %vm568_vm8, %v1764_v38, 0.0 }
 0x3c1   : > { %v1902_v3 = vrot.slane %v1818_v63, 4  ;;  %v1903_v54 = vrot.slane %v1820_v41, 3  ;;  %v1905_v11 = vrot.slane %v1822_v4, 2  ;;  %v1828_v30 = vsel %vm568_vm8, %v1766_v62, 0.0 }
 0x3c2   : > { %v1727_v9 = vadd.f32 %v1726_v61, %v1683_v18  ;;  %v1830_v56 = vsel %vm568_vm8, %v1768_v60, 0.0  ;;  %v1907_v47 = vrot.slane %v1824_v34, 1  ;;  %v1832_v53 = vsel %vm568_vm8, %v1770_v6, 0.0 }
 0x3c3   : > { %v1904_v21 = vsel %vm1883_vm11, %v1903_v54, %v1902_v3  ;;  %v1910_v29 = vrot.slane %v1828_v30, 7  ;;  %v1912_v13 = vrot.slane %v1830_v56, 6  ;;  %v1914_v12 = vrot.slane %v1832_v53, 5 }
 0x3c4   : > { %v1906_v26 = vsel %vm1886_vm12, %v1905_v11, %v1904_v21  ;;  %v1744_v49 = vadd.f32 %v3119_v8, %v1727_v9 }
 0x3c5   : > { %v1908_v55 = vsel %vm1889_vm13, %v1907_v47, %v1906_v26 }
 0x3c6   : > { %v1909_v32 = vsel %vm1891_vm14, %v1826_v59, %v1908_v55  ;;  %v1748_v16 = vmax.f32 %v1744_v49, 0.0 }
 0x3c7   : > { %v1911_v40 = vsel %vm1894_vm15, %v1910_v29, %v1909_v32 }
 0x3c8   : > { %v1913_v45 = vsel %vm1897_vm0, %v1912_v13, %v1911_v40  ;;  %v1772_v10 = vrot.slane %v1748_v16, 4  ;;  %v1774_v2 = vrot.slane %v1748_v16, 5  ;;  %v1776_v33 = vrot.slane %v1748_v16, 6 }
 0x3c9   : > { %v1915_v8 = vsel %vm1900_vm1, %v1914_v12, %v1913_v45  ;;  %v1778_v42 = vrot.slane %v1748_v16, 7  ;;  %v1780_v57 = vrot.slane %v1748_v16, 1  ;;  %v1782_v25 = vrot.slane %v1748_v16, 2 }
 0x3ca   : > { %1949 = vst [vmem:[%s3137_s20 + $0x8] sm:$0xff] %v1915_v8  ;;  %v1834_v23 = vsel %vm568_vm8, %v1772_v10, 0.0  ;;  %v1836_v15 = vsel %vm568_vm8, %v1774_v2, 0.0  ;;  %v1838_v48 = vsel %vm568_vm8, %v1776_v33, 0.0  ;;  %v1784_v36 = vrot.slane %v1748_v16, 3 }
 0x3cb   : > { %v1840_v37 = vsel %vm568_vm8, %v1778_v42, 0.0  ;;  %v1930_v52 = vrot.slane %v1834_v23, 4  ;;  %v1931_v31 = vrot.slane %v1836_v15, 3  ;;  %v1933_v17 = vrot.slane %v1838_v48, 2 }
 0x3cc   : > { %v1844_v43 = vsel %vm568_vm8, %v1780_v57, 0.0  ;;  %v1846_v27 = vsel %vm568_vm8, %v1782_v25, 0.0  ;;  %v1935_v22 = vrot.slane %v1840_v37, 1  ;;  %v1848_v35 = vsel %vm568_vm8, %v1784_v36, 0.0 }
 0x3cd   : > { %v1932_v39 = vsel %vm1883_vm11, %v1931_v31, %v1930_v52  ;;  %v1842_v1 = vsel %vm568_vm8, %v1748_v16, 0.0  ;;  %v1938_v58 = vrot.slane %v1844_v43, 7  ;;  %v1940_v44 = vrot.slane %v1846_v27, 6 }
 0x3ce   : > { %v1934_v50 = vsel %vm1886_vm12, %v1933_v17, %v1932_v39  ;;  %v1942_v28 = vrot.slane %v1848_v35, 5 }
 0x3cf   : > { %v1936_v14 = vsel %vm1889_vm13, %v1935_v22, %v1934_v50 }
 0x3d0   : > { %v1937_v51 = vsel %vm1891_vm14, %v1842_v1, %v1936_v14 }
 0x3d1   : > { %v1939_v5 = vsel %vm1894_vm15, %v1938_v58, %v1937_v51 }
 0x3d2   : > { %v1941_v0 = vsel %vm1897_vm0, %v1940_v44, %v1939_v5 }
 0x3d3   : > { %v1943_v24 = vsel %vm1900_vm1, %v1942_v28, %v1941_v0 }
 0x3d4   : > { %1951 = vst [vmem:[%s3137_s20 + $0x18] sm:$0xff] %v1943_v24 }
 0x3d5 PF: > { %s23_s27 = sadd.s32 1, %s2302_s27   ;;  %s3240_s25 = smov %s2298_s26 }
 0x3d6   : > { %p20_p5 = scmp.ge.s32.totalorder %s23_s27, 4   ;;  %s3241_s26 = smov %s3243_s28 }
 0x3d8   :  { %22 = sbr.rel (!%p20_p5) target bundleno = 2 (0x2), region = 108 }

</bundles_post_ra>
